<compile_context>
chip_gen: v7x
topology: tpu7x:2x2x1
jax: 0.10.0
libtpu: 0.0.40
codegen_flags: <defaults>
</compile_context>

<pallas_src>
import numpy as np
import jax
import jax.numpy as jnp
from jax.experimental import pallas as pl
from jax.experimental.pallas import tpu as pltpu

# ------------- hyperparameters (match PyTorch Model.__init__) ----------------
SEQ_LEN  = 8
PRED_LEN = 4
ENC_IN   = 4
D_MODEL  = 32
N_HEADS  = 8
D_HEAD   = D_MODEL // N_HEADS          # 4
D_FF     = 4 * D_MODEL                 # 128  (EncoderLayer default d_ff)
E_LAYERS = 2
SCALE    = 1.0 / float(np.sqrt(D_HEAD))
EPS      = 1e-5

LANE = 128                              # minimum slab lane width (= D_FF)

# -------------------- per-layer packed slab layout (row offsets) --------------
OFF_WQKV = 0                            # (D_MODEL, 3*D_MODEL)
OFF_WO   = D_MODEL                      # (D_MODEL, D_MODEL)
OFF_W1   = 2 * D_MODEL                  # (D_MODEL, D_FF)
OFF_W2   = 3 * D_MODEL                  # (D_FF, D_MODEL)
OFF_VEC  = 3 * D_MODEL + D_FF           # 8 rows: bqkv, bo, n1w, n1b, b1, b2, n2w, n2b
RPL      = OFF_VEC + 8                  # rows per encoder layer (232)
GOFF     = E_LAYERS * RPL               # 464
WCONV_ROWS = 16                         # 3*ENC_IN=12 rows of conv weight, padded to 16


def make_layout(batch):
    """Row offsets for the batch-dependent tail of the slab (all 8-row aligned)."""
    BL = batch * SEQ_LEN
    NCOL = N_HEADS * BL
    lane = max(LANE, NCOL)
    off_wconv = GOFF
    off_pos = off_wconv + WCONV_ROWS            # pre-replicated positional emb (BL rows)
    off_final = off_pos + BL                    # 8 rows: enw, enb, wd, bd
    off_maskrep = off_final + 8                 # NCOL rows: [head_kv_mask | rep_mat]
    off_sameb = off_maskrep + NCOL              # BL rows: same-batch mask (f32)
    total = ((off_sameb + BL + 7) // 8) * 8
    return dict(BL=BL, NCOL=NCOL, lane=lane, wconv=off_wconv, pos=off_pos,
                final=off_final, maskrep=off_maskrep, sameb=off_sameb, total=total)


# ----------------------------- Pallas kernel ---------------------------------
def _layer_norm(x, w, b):
    mu = jnp.mean(x, axis=-1, keepdims=True)
    var = jnp.mean(jnp.square(x - mu), axis=-1, keepdims=True)
    return (x - mu) * jax.lax.rsqrt(var + EPS) * w + b


def make_kernel(batch):
    lay = make_layout(batch)
    BL, NCOL = lay['BL'], lay['NCOL']

    def transformer_kernel(xcat_ref, slab_ref, out_ref):
        f32 = jnp.float32

        # ---- DataEmbedding: im2col (built in wrapper) x conv weight + PE -------
        wconv = slab_ref[lay['wconv']:lay['wconv'] + WCONV_ROWS, 0:D_MODEL]   # (16, D)
        pos   = slab_ref[lay['pos']:lay['pos'] + BL, 0:D_MODEL]               # (BL, D)
        h = jnp.dot(xcat_ref[...], wconv, preferred_element_type=f32) + pos   # (BL, D)

        # ---- E_LAYERS x EncoderLayer(FullAttention) ----------------------------
        for lyr in range(E_LAYERS):
            base = lyr * RPL
            wqkv = slab_ref[base + OFF_WQKV:base + OFF_WQKV + D_MODEL, 0:3 * D_MODEL]
            wo   = slab_ref[base + OFF_WO:base + OFF_WO + D_MODEL, 0:D_MODEL]
            w1   = slab_ref[base + OFF_W1:base + OFF_W1 + D_MODEL, 0:D_FF]
            w2   = slab_ref[base + OFF_W2:base + OFF_W2 + D_FF, 0:D_MODEL]
            vecs = slab_ref[base + OFF_VEC:base + OFF_VEC + 8, :]             # (8, lane)
            bqkv = vecs[0:1, 0:3 * D_MODEL]
            bo   = vecs[1:2, 0:D_MODEL]
            n1w  = vecs[2:3, 0:D_MODEL]
            n1b  = vecs[3:4, 0:D_MODEL]
            b1   = vecs[4:5, 0:D_FF]
            b2   = vecs[5:6, 0:D_MODEL]
            n2w  = vecs[6:7, 0:D_MODEL]
            n2b  = vecs[7:8, 0:D_MODEL]

            # host-precomputed constants (re-read per layer: cheap vld, short live ranges)
            maskrep = slab_ref[lay['maskrep']:lay['maskrep'] + NCOL, :]
            head_kv_mask = maskrep[:, 0:D_MODEL]                    # (NCOL, D) f32
            rep = maskrep[:, D_MODEL:D_MODEL + BL]                  # (NCOL, BL) replication
            same_b = slab_ref[lay['sameb']:lay['sameb'] + BL, 0:NCOL]  # (BL, NCOL) f32

            # fused Q/K/V projection: one (BL, D) x (D, 3D) matmul
            qkv = jnp.dot(h, wqkv, preferred_element_type=f32) + bqkv        # (BL, 3D)
            q = qkv[:, 0:D_MODEL]
            k = qkv[:, D_MODEL:2 * D_MODEL]
            v = qkv[:, 2 * D_MODEL:3 * D_MODEL]

            # head-block-diagonal K/V stacks via MXU replication (no concat copies):
            # k_bd[h*BL+i, d] = k[i, d] if d in head h else 0
            k_bd = jnp.dot(rep, k, preferred_element_type=f32) * head_kv_mask  # (NCOL, D)
            v_bd = jnp.dot(rep, v, preferred_element_type=f32) * head_kv_mask  # (NCOL, D)

            # all heads' scores in one matmul: s[r, h*BL + c] = q_h[r] . k_h[c]
            s = jax.lax.dot_general(q, k_bd, (((1,), (1,)), ((), ())),
                                    preferred_element_type=f32) * SCALE        # (BL, NCOL)
            m = jnp.max(s, axis=-1, keepdims=True)    # per-row shift; ratios stay exact
            p = jnp.exp(s - m) * same_b               # zero cross-batch columns after exp

            # deferred softmax normalization (exact: v_bd is head-block-diagonal)
            o_un  = jnp.dot(p, v_bd, preferred_element_type=f32)          # (BL, D)
            denom = jnp.dot(p, head_kv_mask, preferred_element_type=f32)  # (BL, D)
            o = o_un * pl.reciprocal(denom, approx=True)
            attn = jnp.dot(o, wo, preferred_element_type=f32) + bo        # out projection

            # residual + norm1, position-wise FFN (Conv1d k=1 == Linear), norm2
            x1 = _layer_norm(h + attn, n1w, n1b)
            y = jnp.maximum(jnp.dot(x1, w1, preferred_element_type=f32) + b1, 0.0)
            y = jnp.dot(y, w2, preferred_element_type=f32) + b2
            h = _layer_norm(x1 + y, n2w, n2b)

        # ---- final encoder LayerNorm + dense_feature on ALL rows ----------------
        finals = slab_ref[lay['final']:lay['final'] + 8, :]
        enw = finals[0:1, 0:D_MODEL]
        enb = finals[1:2, 0:D_MODEL]
        wd  = finals[2:3, 0:D_MODEL]          # dense_feature weight as a (1, D) row
        bd  = finals[3:4, 0:1]                # dense_feature bias

        h = _layer_norm(h, enw, enb)
        # lane-oriented projection: (1, D) x (BL, D)^T -> (1, BL); wrapper slices pred steps
        proj = jax.lax.dot_general(wd, h, (((1,), (1,)), ((), ())),
                                   preferred_element_type=f32) + bd
        out_ref[...] = proj

    return transformer_kernel


# ------------------------------ wrapper ---------------------------------------
def pack_params(params, batch):
    """Pack every parameter + host-precomputed constants into one lane-dense f32 slab."""
    lay = make_layout(batch)
    lane, BL, NCOL = lay['lane'], lay['BL'], lay['NCOL']

    def row2d(a, rows=None):
        a = np.asarray(a, np.float32)
        if a.ndim == 1:
            a = a[None, :]
        nrows = rows if rows is not None else a.shape[0]
        buf = np.zeros((nrows, lane), np.float32)
        buf[:a.shape[0], :a.shape[1]] = a
        return buf

    blocks = []
    for lp in params['layers']:
        wqkv = np.concatenate([np.asarray(lp['wq']), np.asarray(lp['wk']),
                               np.asarray(lp['wv'])], axis=1)                 # (D, 3D)
        bqkv = np.concatenate([np.asarray(lp['bq']), np.asarray(lp['bk']),
                               np.asarray(lp['bv'])], axis=0)                 # (3D,)
        blocks += [row2d(wqkv), row2d(lp['wo']), row2d(lp['w1']), row2d(lp['w2']),
                   row2d(bqkv), row2d(lp['bo']),
                   row2d(lp['n1w']), row2d(lp['n1b']),
                   row2d(lp['b1']), row2d(lp['b2']),
                   row2d(lp['n2w']), row2d(lp['n2b'])]

    # TokenEmbedding conv weight in im2col (3C, D) order, padded to 16 rows.
    blocks.append(row2d(params['wconv'], rows=WCONV_ROWS))
    # Positional embedding pre-replicated across the folded batch.
    blocks.append(row2d(np.tile(np.asarray(params['pos'], np.float32), (batch, 1))))
    # Final vectors: encoder norm, dense_feature (8 rows).
    finals = np.zeros((8, lane), np.float32)
    finals[0, :D_MODEL] = np.asarray(params['enw'])
    finals[1, :D_MODEL] = np.asarray(params['enb'])
    finals[2, :D_MODEL] = np.asarray(params['wd']).reshape(-1)
    finals[3, 0] = float(np.asarray(params['bd']).reshape(-1)[0])
    blocks.append(finals)
    # Constant head-structure masks (precomputed on host, DMA'd with the weights).
    mr = np.zeros((NCOL, lane), np.float32)
    r = np.arange(NCOL)[:, None]
    d = np.arange(D_MODEL)[None, :]
    mr[:, :D_MODEL] = ((r // BL) == (d // D_HEAD)).astype(np.float32)       # head feature mask
    mr[:, D_MODEL:D_MODEL + BL] = np.tile(np.eye(BL, dtype=np.float32), (N_HEADS, 1))  # rep
    blocks.append(mr)
    sb = np.zeros((BL, lane), np.float32)
    rr = np.arange(BL)[:, None]
    cc = np.arange(NCOL)[None, :]
    sb[:, :NCOL] = ((rr // SEQ_LEN) == ((cc % BL) // SEQ_LEN)).astype(np.float32)
    blocks.append(sb)

    slab = np.concatenate(blocks, axis=0)
    pad = lay['total'] - slab.shape[0]
    if pad:
        slab = np.pad(slab, ((0, pad), (0, 0)))
    assert slab.shape == (lay['total'], lane)
    return jnp.asarray(slab)


def transformer_forward(x_enc, slab):
    B, L, C = x_enc.shape
    assert L == SEQ_LEN and C == ENC_IN
    lay = make_layout(B)
    assert slab.shape == (lay['total'], lay['lane'])
    BL = lay['BL']

    # Circular-conv im2col in the wrapper (cheap XLA gather, keeps relayouts out of the kernel).
    xcat = jnp.concatenate([jnp.roll(x_enc, 1, axis=1), x_enc,
                            jnp.roll(x_enc, -1, axis=1)], axis=-1)        # (B, L, 3C)
    xcat = xcat.reshape(BL, 3 * ENC_IN).astype(jnp.float32)
    xcat = jnp.pad(xcat, ((0, 0), (0, WCONV_ROWS - 3 * ENC_IN)))          # (BL, 16)

    out = pl.pallas_call(
        make_kernel(B),
        out_shape=jax.ShapeDtypeStruct((1, BL), jnp.float32),
        grid=(1,),
        in_specs=[pl.BlockSpec((BL, WCONV_ROWS), lambda i: (0, 0)),
                  pl.BlockSpec((lay['total'], lay['lane']), lambda i: (0, 0))],
        out_specs=pl.BlockSpec((1, BL), lambda i: (0, 0)),
        compiler_params=pltpu.CompilerParams(
            dimension_semantics=("arbitrary",)),
    )(xcat, slab)
    # TODO(synk): on v7x with larger batch, add a leading "parallel" grid axis splitting the
    # folded rows across the 2 TensorCores (only pays off at >=128 rows per core).
    out = out.reshape(B, SEQ_LEN)
    return out[:, -PRED_LEN:]


# ------------------------- deterministic parameters ---------------------------
def positional_embedding(L, D):
    pe = np.zeros((L, D), dtype=np.float32)
    position = np.arange(L, dtype=np.float32)[:, None]
    div_term = np.exp(np.arange(0, D, 2, dtype=np.float32) * -(np.log(10000.0) / D))
    pe[:, 0::2] = np.sin(position * div_term)
    pe[:, 1::2] = np.cos(position * div_term)
    return jnp.asarray(pe)


def init_params(key):
    keys = iter(jax.random.split(key, 64))

    def normal(shape, scale=0.1):
        return scale * jax.random.normal(next(keys), shape, dtype=jnp.float32)

    params = {
        # TokenEmbedding Conv1d(k=3, circular, no bias) in im2col (3C, D) form.
        # (Self-initialized; importing real PyTorch Conv1d weights would require
        #  flattening its (D, C, k) layout into this (k*C, D) order.)
        'wconv': normal((3 * ENC_IN, D_MODEL), 0.3),
        'pos': positional_embedding(SEQ_LEN, D_MODEL),
        'enw': jnp.ones((D_MODEL,), jnp.float32),
        'enb': jnp.zeros((D_MODEL,), jnp.float32),
        'wd': normal((D_MODEL, 1)),
        'bd': normal((1, 1), 0.01),
        'layers': [],
    }
    for _ in range(E_LAYERS):
        params['layers'].append(dict(
            wq=normal((D_MODEL, D_MODEL)), bq=normal((D_MODEL,), 0.01),
            wk=normal((D_MODEL, D_MODEL)), bk=normal((D_MODEL,), 0.01),
            wv=normal((D_MODEL, D_MODEL)), bv=normal((D_MODEL,), 0.01),
            wo=normal((D_MODEL, D_MODEL)), bo=normal((D_MODEL,), 0.01),
            n1w=jnp.ones((D_MODEL,), jnp.float32), n1b=jnp.zeros((D_MODEL,), jnp.float32),
            w1=normal((D_MODEL, D_FF)), b1=normal((D_FF,), 0.01),
            w2=normal((D_FF, D_MODEL)), b2=normal((D_MODEL,), 0.01),
            n2w=jnp.ones((D_MODEL,), jnp.float32), n2b=jnp.zeros((D_MODEL,), jnp.float32),
        ))
    return params


# ------------------------- pure-JAX reference ----------------------------------
def reference_forward(x_enc, params):
    HI = jax.lax.Precision.HIGHEST
    B, L, C = x_enc.shape
    x_cat = jnp.concatenate(
        [jnp.roll(x_enc, 1, axis=1), x_enc, jnp.roll(x_enc, -1, axis=1)], axis=-1)
    h = jnp.einsum('blc,cd->bld', x_cat, params['wconv'], precision=HI) + params['pos'][None]

    def ln(x, w, b):
        mu = x.mean(-1, keepdims=True)
        var = ((x - mu) ** 2).mean(-1, keepdims=True)
        return (x - mu) / jnp.sqrt(var + EPS) * w + b

    for lp in params['layers']:
        q = (jnp.einsum('bld,de->ble', h, lp['wq'], precision=HI) + lp['bq']
             ).reshape(B, L, N_HEADS, D_HEAD)
        k = (jnp.einsum('bld,de->ble', h, lp['wk'], precision=HI) + lp['bk']
             ).reshape(B, L, N_HEADS, D_HEAD)
        v = (jnp.einsum('bld,de->ble', h, lp['wv'], precision=HI) + lp['bv']
             ).reshape(B, L, N_HEADS, D_HEAD)
        s = jnp.einsum('blhe,bshe->bhls', q, k, precision=HI) * SCALE
        p = jax.nn.softmax(s, axis=-1)
        o = jnp.einsum('bhls,bshe->blhe', p, v, precision=HI).reshape(B, L, D_MODEL)
        attn = jnp.einsum('bld,de->ble', o, lp['wo'], precision=HI) + lp['bo']
        x1 = ln(h + attn, lp['n1w'], lp['n1b'])
        y = jax.nn.relu(jnp.einsum('bld,df->blf', x1, lp['w1'], precision=HI) + lp['b1'])
        y = jnp.einsum('blf,fd->bld', y, lp['w2'], precision=HI) + lp['b2']
        h = ln(x1 + y, lp['n2w'], lp['n2b'])

    h = ln(h, params['enw'], params['enb'])
    out = jnp.einsum('bld,do->blo', h, params['wd'], precision=HI) + params['bd']
    return out[:, -PRED_LEN:, 0]


# ---------------------------------- main ---------------------------------------
if __name__ == "__main__":
    key = jax.random.PRNGKey(0)
    k_x, k_p = jax.random.split(key)

    B = 2
    x_enc = jax.random.normal(k_x, (B, SEQ_LEN, ENC_IN), dtype=jnp.float32)
    params = init_params(k_p)
    slab = pack_params(params, B)

    out = transformer_forward(x_enc, slab)
    out = jax.block_until_ready(out)
    assert out.shape == (B, PRED_LEN)

    ref = reference_forward(x_enc, params)
    np.testing.assert_allclose(np.asarray(out), np.asarray(ref), rtol=3e-3, atol=3e-3)

    print("KERNEL_OK")
</pallas_src>

<mosaic_0001>
module attributes {stable_mosaic.version = 11 : i64} {
  func.func @transformer_kernel(%arg0: i32, %arg1: memref<16x16xf32, #tpu.memory_space<vmem>>, %arg2: memref<648x128xf32, #tpu.memory_space<vmem>>, %arg3: memref<1x16xf32, #tpu.memory_space<vmem>>) attributes {dimension_semantics = [#tpu.dimension_semantics<arbitrary>], iteration_bounds = array<i64: 1>, scalar_prefetch = 0 : i64, scratch_operands = 0 : i64, tpu.core_type = #tpu.core_type<tc>, window_params = [{pipeline_mode = #tpu.pipeline_mode<synchronous>, transform_indices = @transform_0, window_bounds = array<i64: 16, 16>}, {pipeline_mode = #tpu.pipeline_mode<synchronous>, transform_indices = @transform_1, window_bounds = array<i64: 648, 128>}, {pipeline_mode = #tpu.pipeline_mode<synchronous>, transform_indices = @transform_2, window_bounds = array<i64: 1, 16>}]} {
    %c464 = arith.constant 464 : index
    %c0 = arith.constant 0 : index
    %0 = vector.load %arg2[%c464, %c0] : memref<648x128xf32, #tpu.memory_space<vmem>>, vector<16x32xf32>
    %c480 = arith.constant 480 : index
    %c0_0 = arith.constant 0 : index
    %1 = vector.load %arg2[%c480, %c0_0] : memref<648x128xf32, #tpu.memory_space<vmem>>, vector<16x32xf32>
    %c0_1 = arith.constant 0 : index
    %c0_2 = arith.constant 0 : index
    %2 = vector.load %arg1[%c0_1, %c0_2] : memref<16x16xf32, #tpu.memory_space<vmem>>, vector<16x16xf32>
    %cst = arith.constant dense<0.000000e+00> : vector<16x32xf32>
    %3 = tpu.matmul %2, %0, %cst {dimension_numbers = #tpu.dot_dimension_numbers<[1], [0], [0], [1], [0, 0, 1, 1], [], []>} : vector<16x16xf32>, vector<16x32xf32>, vector<16x32xf32> -> vector<16x32xf32>
    %4 = arith.addf %3, %1 : vector<16x32xf32>
    %c0_3 = arith.constant 0 : index
    %c0_4 = arith.constant 0 : index
    %5 = vector.load %arg2[%c0_3, %c0_4] : memref<648x128xf32, #tpu.memory_space<vmem>>, vector<32x96xf32>
    %c32 = arith.constant 32 : index
    %c0_5 = arith.constant 0 : index
    %6 = vector.load %arg2[%c32, %c0_5] : memref<648x128xf32, #tpu.memory_space<vmem>>, vector<32x32xf32>
    %c64 = arith.constant 64 : index
    %c0_6 = arith.constant 0 : index
    %7 = vector.load %arg2[%c64, %c0_6] : memref<648x128xf32, #tpu.memory_space<vmem>>, vector<32x128xf32>
    %c96 = arith.constant 96 : index
    %c0_7 = arith.constant 0 : index
    %8 = vector.load %arg2[%c96, %c0_7] : memref<648x128xf32, #tpu.memory_space<vmem>>, vector<128x32xf32>
    %c224 = arith.constant 224 : index
    %c0_8 = arith.constant 0 : index
    %9 = vector.load %arg2[%c224, %c0_8] : memref<648x128xf32, #tpu.memory_space<vmem>>, vector<8x128xf32>
    %10 = vector.extract_strided_slice %9 {offsets = [0, 0], sizes = [1, 96], strides = [1, 1]} : vector<8x128xf32> to vector<1x96xf32>
    %11 = vector.extract_strided_slice %9 {offsets = [1, 0], sizes = [1, 32], strides = [1, 1]} : vector<8x128xf32> to vector<1x32xf32>
    %12 = vector.extract_strided_slice %9 {offsets = [2, 0], sizes = [1, 32], strides = [1, 1]} : vector<8x128xf32> to vector<1x32xf32>
    %13 = vector.extract_strided_slice %9 {offsets = [3, 0], sizes = [1, 32], strides = [1, 1]} : vector<8x128xf32> to vector<1x32xf32>
    %14 = vector.extract_strided_slice %9 {offsets = [4, 0], sizes = [1, 128], strides = [1, 1]} : vector<8x128xf32> to vector<1x128xf32>
    %15 = vector.extract_strided_slice %9 {offsets = [5, 0], sizes = [1, 32], strides = [1, 1]} : vector<8x128xf32> to vector<1x32xf32>
    %16 = vector.extract_strided_slice %9 {offsets = [6, 0], sizes = [1, 32], strides = [1, 1]} : vector<8x128xf32> to vector<1x32xf32>
    %17 = vector.extract_strided_slice %9 {offsets = [7, 0], sizes = [1, 32], strides = [1, 1]} : vector<8x128xf32> to vector<1x32xf32>
    %c504 = arith.constant 504 : index
    %c0_9 = arith.constant 0 : index
    %18 = vector.load %arg2[%c504, %c0_9] : memref<648x128xf32, #tpu.memory_space<vmem>>, vector<128x128xf32>
    %19 = vector.extract_strided_slice %18 {offsets = [0, 0], sizes = [128, 32], strides = [1, 1]} : vector<128x128xf32> to vector<128x32xf32>
    %20 = vector.extract_strided_slice %18 {offsets = [0, 32], sizes = [128, 16], strides = [1, 1]} : vector<128x128xf32> to vector<128x16xf32>
    %c632 = arith.constant 632 : index
    %c0_10 = arith.constant 0 : index
    %21 = vector.load %arg2[%c632, %c0_10] : memref<648x128xf32, #tpu.memory_space<vmem>>, vector<16x128xf32>
    %cst_11 = arith.constant dense<0.000000e+00> : vector<16x96xf32>
    %22 = tpu.matmul %4, %5, %cst_11 {dimension_numbers = #tpu.dot_dimension_numbers<[1], [0], [0], [1], [0, 0, 1, 1], [], []>} : vector<16x32xf32>, vector<32x96xf32>, vector<16x96xf32> -> vector<16x96xf32>
    %23 = vector.broadcast %10 : vector<1x96xf32> to vector<16x96xf32>
    %24 = arith.addf %22, %23 : vector<16x96xf32>
    %25 = vector.extract_strided_slice %24 {offsets = [0, 0], sizes = [16, 32], strides = [1, 1]} : vector<16x96xf32> to vector<16x32xf32>
    %26 = vector.extract_strided_slice %24 {offsets = [0, 32], sizes = [16, 32], strides = [1, 1]} : vector<16x96xf32> to vector<16x32xf32>
    %27 = vector.extract_strided_slice %24 {offsets = [0, 64], sizes = [16, 32], strides = [1, 1]} : vector<16x96xf32> to vector<16x32xf32>
    %cst_12 = arith.constant dense<0.000000e+00> : vector<128x32xf32>
    %28 = tpu.matmul %20, %26, %cst_12 {dimension_numbers = #tpu.dot_dimension_numbers<[1], [0], [0], [1], [0, 0, 1, 1], [], []>} : vector<128x16xf32>, vector<16x32xf32>, vector<128x32xf32> -> vector<128x32xf32>
    %29 = arith.mulf %28, %19 : vector<128x32xf32>
    %cst_13 = arith.constant dense<0.000000e+00> : vector<128x32xf32>
    %30 = tpu.matmul %20, %27, %cst_13 {dimension_numbers = #tpu.dot_dimension_numbers<[1], [0], [0], [1], [0, 0, 1, 1], [], []>} : vector<128x16xf32>, vector<16x32xf32>, vector<128x32xf32> -> vector<128x32xf32>
    %31 = arith.mulf %30, %19 : vector<128x32xf32>
    %cst_14 = arith.constant dense<0.000000e+00> : vector<16x128xf32>
    %32 = tpu.matmul %25, %29, %cst_14 {dimension_numbers = #tpu.dot_dimension_numbers<[1], [1], [0], [0], [0, 0, 1, 0], [], []>} : vector<16x32xf32>, vector<128x32xf32>, vector<16x128xf32> -> vector<16x128xf32>
    %cst_15 = arith.constant 5.000000e-01 : f32
    %33 = vector.broadcast %cst_15 : f32 to vector<16x128xf32>
    %34 = arith.mulf %32, %33 : vector<16x128xf32>
    %cst_16 = arith.constant dense<0xFF800000> : vector<16xf32>
    %35 = vector.multi_reduction <maximumf>, %34, %cst_16 [1] : vector<16x128xf32> to vector<16xf32>
    %36 = vector.shape_cast %35 : vector<16xf32> to vector<16x1xf32>
    %37 = vector.broadcast %36 : vector<16x1xf32> to vector<16x128xf32>
    %38 = arith.subf %34, %37 : vector<16x128xf32>
    %39 = math.exp %38 : vector<16x128xf32>
    %40 = arith.mulf %39, %21 : vector<16x128xf32>
    %cst_17 = arith.constant dense<0.000000e+00> : vector<16x32xf32>
    %41 = tpu.matmul %40, %31, %cst_17 {dimension_numbers = #tpu.dot_dimension_numbers<[1], [0], [0], [1], [0, 0, 1, 1], [], []>} : vector<16x128xf32>, vector<128x32xf32>, vector<16x32xf32> -> vector<16x32xf32>
    %cst_18 = arith.constant dense<0.000000e+00> : vector<16x32xf32>
    %42 = tpu.matmul %40, %19, %cst_18 {dimension_numbers = #tpu.dot_dimension_numbers<[1], [0], [0], [1], [0, 0, 1, 1], [], []>} : vector<16x128xf32>, vector<128x32xf32>, vector<16x32xf32> -> vector<16x32xf32>
    %43 = tpu.reciprocal %42 {approx = true} : vector<16x32xf32> -> vector<16x32xf32>
    %44 = arith.mulf %41, %43 : vector<16x32xf32>
    %cst_19 = arith.constant dense<0.000000e+00> : vector<16x32xf32>
    %45 = tpu.matmul %44, %6, %cst_19 {dimension_numbers = #tpu.dot_dimension_numbers<[1], [0], [0], [1], [0, 0, 1, 1], [], []>} : vector<16x32xf32>, vector<32x32xf32>, vector<16x32xf32> -> vector<16x32xf32>
    %46 = vector.broadcast %11 : vector<1x32xf32> to vector<16x32xf32>
    %47 = arith.addf %45, %46 : vector<16x32xf32>
    %48 = arith.addf %4, %47 : vector<16x32xf32>
    %cst_20 = arith.constant dense<0.000000e+00> : vector<16xf32>
    %49 = vector.multi_reduction <add>, %48, %cst_20 [1] : vector<16x32xf32> to vector<16xf32>
    %50 = vector.shape_cast %49 : vector<16xf32> to vector<16x1xf32>
    %cst_21 = arith.constant 3.200000e+01 : f32
    %51 = vector.broadcast %cst_21 : f32 to vector<16x1xf32>
    %52 = arith.divf %50, %51 : vector<16x1xf32>
    %53 = vector.broadcast %52 : vector<16x1xf32> to vector<16x32xf32>
    %54 = arith.subf %48, %53 : vector<16x32xf32>
    %55 = arith.mulf %54, %54 : vector<16x32xf32>
    %cst_22 = arith.constant dense<0.000000e+00> : vector<16xf32>
    %56 = vector.multi_reduction <add>, %55, %cst_22 [1] : vector<16x32xf32> to vector<16xf32>
    %57 = vector.shape_cast %56 : vector<16xf32> to vector<16x1xf32>
    %cst_23 = arith.constant 3.200000e+01 : f32
    %58 = vector.broadcast %cst_23 : f32 to vector<16x1xf32>
    %59 = arith.divf %57, %58 : vector<16x1xf32>
    %60 = vector.broadcast %52 : vector<16x1xf32> to vector<16x32xf32>
    %61 = arith.subf %48, %60 : vector<16x32xf32>
    %cst_24 = arith.constant 9.99999974E-6 : f32
    %62 = vector.broadcast %cst_24 : f32 to vector<16x1xf32>
    %63 = arith.addf %59, %62 : vector<16x1xf32>
    %64 = math.rsqrt %63 : vector<16x1xf32>
    %65 = vector.broadcast %64 : vector<16x1xf32> to vector<16x32xf32>
    %66 = arith.mulf %61, %65 : vector<16x32xf32>
    %67 = vector.broadcast %12 : vector<1x32xf32> to vector<16x32xf32>
    %68 = arith.mulf %66, %67 : vector<16x32xf32>
    %69 = vector.broadcast %13 : vector<1x32xf32> to vector<16x32xf32>
    %70 = arith.addf %68, %69 : vector<16x32xf32>
    %cst_25 = arith.constant dense<0.000000e+00> : vector<16x128xf32>
    %71 = tpu.matmul %70, %7, %cst_25 {dimension_numbers = #tpu.dot_dimension_numbers<[1], [0], [0], [1], [0, 0, 1, 1], [], []>} : vector<16x32xf32>, vector<32x128xf32>, vector<16x128xf32> -> vector<16x128xf32>
    %72 = vector.broadcast %14 : vector<1x128xf32> to vector<16x128xf32>
    %73 = arith.addf %71, %72 : vector<16x128xf32>
    %cst_26 = arith.constant 0.000000e+00 : f32
    %74 = vector.broadcast %cst_26 : f32 to vector<16x128xf32>
    %75 = arith.maximumf %73, %74 : vector<16x128xf32>
    %cst_27 = arith.constant dense<0.000000e+00> : vector<16x32xf32>
    %76 = tpu.matmul %75, %8, %cst_27 {dimension_numbers = #tpu.dot_dimension_numbers<[1], [0], [0], [1], [0, 0, 1, 1], [], []>} : vector<16x128xf32>, vector<128x32xf32>, vector<16x32xf32> -> vector<16x32xf32>
    %77 = vector.broadcast %15 : vector<1x32xf32> to vector<16x32xf32>
    %78 = arith.addf %76, %77 : vector<16x32xf32>
    %79 = arith.addf %70, %78 : vector<16x32xf32>
    %cst_28 = arith.constant dense<0.000000e+00> : vector<16xf32>
    %80 = vector.multi_reduction <add>, %79, %cst_28 [1] : vector<16x32xf32> to vector<16xf32>
    %81 = vector.shape_cast %80 : vector<16xf32> to vector<16x1xf32>
    %cst_29 = arith.constant 3.200000e+01 : f32
    %82 = vector.broadcast %cst_29 : f32 to vector<16x1xf32>
    %83 = arith.divf %81, %82 : vector<16x1xf32>
    %84 = vector.broadcast %83 : vector<16x1xf32> to vector<16x32xf32>
    %85 = arith.subf %79, %84 : vector<16x32xf32>
    %86 = arith.mulf %85, %85 : vector<16x32xf32>
    %cst_30 = arith.constant dense<0.000000e+00> : vector<16xf32>
    %87 = vector.multi_reduction <add>, %86, %cst_30 [1] : vector<16x32xf32> to vector<16xf32>
    %88 = vector.shape_cast %87 : vector<16xf32> to vector<16x1xf32>
    %cst_31 = arith.constant 3.200000e+01 : f32
    %89 = vector.broadcast %cst_31 : f32 to vector<16x1xf32>
    %90 = arith.divf %88, %89 : vector<16x1xf32>
    %91 = vector.broadcast %83 : vector<16x1xf32> to vector<16x32xf32>
    %92 = arith.subf %79, %91 : vector<16x32xf32>
    %cst_32 = arith.constant 9.99999974E-6 : f32
    %93 = vector.broadcast %cst_32 : f32 to vector<16x1xf32>
    %94 = arith.addf %90, %93 : vector<16x1xf32>
    %95 = math.rsqrt %94 : vector<16x1xf32>
    %96 = vector.broadcast %95 : vector<16x1xf32> to vector<16x32xf32>
    %97 = arith.mulf %92, %96 : vector<16x32xf32>
    %98 = vector.broadcast %16 : vector<1x32xf32> to vector<16x32xf32>
    %99 = arith.mulf %97, %98 : vector<16x32xf32>
    %100 = vector.broadcast %17 : vector<1x32xf32> to vector<16x32xf32>
    %101 = arith.addf %99, %100 : vector<16x32xf32>
    %c232 = arith.constant 232 : index
    %c0_33 = arith.constant 0 : index
    %102 = vector.load %arg2[%c232, %c0_33] : memref<648x128xf32, #tpu.memory_space<vmem>>, vector<32x96xf32>
    %c264 = arith.constant 264 : index
    %c0_34 = arith.constant 0 : index
    %103 = vector.load %arg2[%c264, %c0_34] : memref<648x128xf32, #tpu.memory_space<vmem>>, vector<32x32xf32>
    %c296 = arith.constant 296 : index
    %c0_35 = arith.constant 0 : index
    %104 = vector.load %arg2[%c296, %c0_35] : memref<648x128xf32, #tpu.memory_space<vmem>>, vector<32x128xf32>
    %c328 = arith.constant 328 : index
    %c0_36 = arith.constant 0 : index
    %105 = vector.load %arg2[%c328, %c0_36] : memref<648x128xf32, #tpu.memory_space<vmem>>, vector<128x32xf32>
    %c456 = arith.constant 456 : index
    %c0_37 = arith.constant 0 : index
    %106 = vector.load %arg2[%c456, %c0_37] : memref<648x128xf32, #tpu.memory_space<vmem>>, vector<8x128xf32>
    %107 = vector.extract_strided_slice %106 {offsets = [0, 0], sizes = [1, 96], strides = [1, 1]} : vector<8x128xf32> to vector<1x96xf32>
    %108 = vector.extract_strided_slice %106 {offsets = [1, 0], sizes = [1, 32], strides = [1, 1]} : vector<8x128xf32> to vector<1x32xf32>
    %109 = vector.extract_strided_slice %106 {offsets = [2, 0], sizes = [1, 32], strides = [1, 1]} : vector<8x128xf32> to vector<1x32xf32>
    %110 = vector.extract_strided_slice %106 {offsets = [3, 0], sizes = [1, 32], strides = [1, 1]} : vector<8x128xf32> to vector<1x32xf32>
    %111 = vector.extract_strided_slice %106 {offsets = [4, 0], sizes = [1, 128], strides = [1, 1]} : vector<8x128xf32> to vector<1x128xf32>
    %112 = vector.extract_strided_slice %106 {offsets = [5, 0], sizes = [1, 32], strides = [1, 1]} : vector<8x128xf32> to vector<1x32xf32>
    %113 = vector.extract_strided_slice %106 {offsets = [6, 0], sizes = [1, 32], strides = [1, 1]} : vector<8x128xf32> to vector<1x32xf32>
    %114 = vector.extract_strided_slice %106 {offsets = [7, 0], sizes = [1, 32], strides = [1, 1]} : vector<8x128xf32> to vector<1x32xf32>
    %c504_38 = arith.constant 504 : index
    %c0_39 = arith.constant 0 : index
    %115 = vector.load %arg2[%c504_38, %c0_39] : memref<648x128xf32, #tpu.memory_space<vmem>>, vector<128x128xf32>
    %116 = vector.extract_strided_slice %115 {offsets = [0, 0], sizes = [128, 32], strides = [1, 1]} : vector<128x128xf32> to vector<128x32xf32>
    %117 = vector.extract_strided_slice %115 {offsets = [0, 32], sizes = [128, 16], strides = [1, 1]} : vector<128x128xf32> to vector<128x16xf32>
    %c632_40 = arith.constant 632 : index
    %c0_41 = arith.constant 0 : index
    %118 = vector.load %arg2[%c632_40, %c0_41] : memref<648x128xf32, #tpu.memory_space<vmem>>, vector<16x128xf32>
    %cst_42 = arith.constant dense<0.000000e+00> : vector<16x96xf32>
    %119 = tpu.matmul %101, %102, %cst_42 {dimension_numbers = #tpu.dot_dimension_numbers<[1], [0], [0], [1], [0, 0, 1, 1], [], []>} : vector<16x32xf32>, vector<32x96xf32>, vector<16x96xf32> -> vector<16x96xf32>
    %120 = vector.broadcast %107 : vector<1x96xf32> to vector<16x96xf32>
    %121 = arith.addf %119, %120 : vector<16x96xf32>
    %122 = vector.extract_strided_slice %121 {offsets = [0, 0], sizes = [16, 32], strides = [1, 1]} : vector<16x96xf32> to vector<16x32xf32>
    %123 = vector.extract_strided_slice %121 {offsets = [0, 32], sizes = [16, 32], strides = [1, 1]} : vector<16x96xf32> to vector<16x32xf32>
    %124 = vector.extract_strided_slice %121 {offsets = [0, 64], sizes = [16, 32], strides = [1, 1]} : vector<16x96xf32> to vector<16x32xf32>
    %cst_43 = arith.constant dense<0.000000e+00> : vector<128x32xf32>
    %125 = tpu.matmul %117, %123, %cst_43 {dimension_numbers = #tpu.dot_dimension_numbers<[1], [0], [0], [1], [0, 0, 1, 1], [], []>} : vector<128x16xf32>, vector<16x32xf32>, vector<128x32xf32> -> vector<128x32xf32>
    %126 = arith.mulf %125, %116 : vector<128x32xf32>
    %cst_44 = arith.constant dense<0.000000e+00> : vector<128x32xf32>
    %127 = tpu.matmul %117, %124, %cst_44 {dimension_numbers = #tpu.dot_dimension_numbers<[1], [0], [0], [1], [0, 0, 1, 1], [], []>} : vector<128x16xf32>, vector<16x32xf32>, vector<128x32xf32> -> vector<128x32xf32>
    %128 = arith.mulf %127, %116 : vector<128x32xf32>
    %cst_45 = arith.constant dense<0.000000e+00> : vector<16x128xf32>
    %129 = tpu.matmul %122, %126, %cst_45 {dimension_numbers = #tpu.dot_dimension_numbers<[1], [1], [0], [0], [0, 0, 1, 0], [], []>} : vector<16x32xf32>, vector<128x32xf32>, vector<16x128xf32> -> vector<16x128xf32>
    %cst_46 = arith.constant 5.000000e-01 : f32
    %130 = vector.broadcast %cst_46 : f32 to vector<16x128xf32>
    %131 = arith.mulf %129, %130 : vector<16x128xf32>
    %cst_47 = arith.constant dense<0xFF800000> : vector<16xf32>
    %132 = vector.multi_reduction <maximumf>, %131, %cst_47 [1] : vector<16x128xf32> to vector<16xf32>
    %133 = vector.shape_cast %132 : vector<16xf32> to vector<16x1xf32>
    %134 = vector.broadcast %133 : vector<16x1xf32> to vector<16x128xf32>
    %135 = arith.subf %131, %134 : vector<16x128xf32>
    %136 = math.exp %135 : vector<16x128xf32>
    %137 = arith.mulf %136, %118 : vector<16x128xf32>
    %cst_48 = arith.constant dense<0.000000e+00> : vector<16x32xf32>
    %138 = tpu.matmul %137, %128, %cst_48 {dimension_numbers = #tpu.dot_dimension_numbers<[1], [0], [0], [1], [0, 0, 1, 1], [], []>} : vector<16x128xf32>, vector<128x32xf32>, vector<16x32xf32> -> vector<16x32xf32>
    %cst_49 = arith.constant dense<0.000000e+00> : vector<16x32xf32>
    %139 = tpu.matmul %137, %116, %cst_49 {dimension_numbers = #tpu.dot_dimension_numbers<[1], [0], [0], [1], [0, 0, 1, 1], [], []>} : vector<16x128xf32>, vector<128x32xf32>, vector<16x32xf32> -> vector<16x32xf32>
    %140 = tpu.reciprocal %139 {approx = true} : vector<16x32xf32> -> vector<16x32xf32>
    %141 = arith.mulf %138, %140 : vector<16x32xf32>
    %cst_50 = arith.constant dense<0.000000e+00> : vector<16x32xf32>
    %142 = tpu.matmul %141, %103, %cst_50 {dimension_numbers = #tpu.dot_dimension_numbers<[1], [0], [0], [1], [0, 0, 1, 1], [], []>} : vector<16x32xf32>, vector<32x32xf32>, vector<16x32xf32> -> vector<16x32xf32>
    %143 = vector.broadcast %108 : vector<1x32xf32> to vector<16x32xf32>
    %144 = arith.addf %142, %143 : vector<16x32xf32>
    %145 = arith.addf %101, %144 : vector<16x32xf32>
    %cst_51 = arith.constant dense<0.000000e+00> : vector<16xf32>
    %146 = vector.multi_reduction <add>, %145, %cst_51 [1] : vector<16x32xf32> to vector<16xf32>
    %147 = vector.shape_cast %146 : vector<16xf32> to vector<16x1xf32>
    %cst_52 = arith.constant 3.200000e+01 : f32
    %148 = vector.broadcast %cst_52 : f32 to vector<16x1xf32>
    %149 = arith.divf %147, %148 : vector<16x1xf32>
    %150 = vector.broadcast %149 : vector<16x1xf32> to vector<16x32xf32>
    %151 = arith.subf %145, %150 : vector<16x32xf32>
    %152 = arith.mulf %151, %151 : vector<16x32xf32>
    %cst_53 = arith.constant dense<0.000000e+00> : vector<16xf32>
    %153 = vector.multi_reduction <add>, %152, %cst_53 [1] : vector<16x32xf32> to vector<16xf32>
    %154 = vector.shape_cast %153 : vector<16xf32> to vector<16x1xf32>
    %cst_54 = arith.constant 3.200000e+01 : f32
    %155 = vector.broadcast %cst_54 : f32 to vector<16x1xf32>
    %156 = arith.divf %154, %155 : vector<16x1xf32>
    %157 = vector.broadcast %149 : vector<16x1xf32> to vector<16x32xf32>
    %158 = arith.subf %145, %157 : vector<16x32xf32>
    %cst_55 = arith.constant 9.99999974E-6 : f32
    %159 = vector.broadcast %cst_55 : f32 to vector<16x1xf32>
    %160 = arith.addf %156, %159 : vector<16x1xf32>
    %161 = math.rsqrt %160 : vector<16x1xf32>
    %162 = vector.broadcast %161 : vector<16x1xf32> to vector<16x32xf32>
    %163 = arith.mulf %158, %162 : vector<16x32xf32>
    %164 = vector.broadcast %109 : vector<1x32xf32> to vector<16x32xf32>
    %165 = arith.mulf %163, %164 : vector<16x32xf32>
    %166 = vector.broadcast %110 : vector<1x32xf32> to vector<16x32xf32>
    %167 = arith.addf %165, %166 : vector<16x32xf32>
    %cst_56 = arith.constant dense<0.000000e+00> : vector<16x128xf32>
    %168 = tpu.matmul %167, %104, %cst_56 {dimension_numbers = #tpu.dot_dimension_numbers<[1], [0], [0], [1], [0, 0, 1, 1], [], []>} : vector<16x32xf32>, vector<32x128xf32>, vector<16x128xf32> -> vector<16x128xf32>
    %169 = vector.broadcast %111 : vector<1x128xf32> to vector<16x128xf32>
    %170 = arith.addf %168, %169 : vector<16x128xf32>
    %cst_57 = arith.constant 0.000000e+00 : f32
    %171 = vector.broadcast %cst_57 : f32 to vector<16x128xf32>
    %172 = arith.maximumf %170, %171 : vector<16x128xf32>
    %cst_58 = arith.constant dense<0.000000e+00> : vector<16x32xf32>
    %173 = tpu.matmul %172, %105, %cst_58 {dimension_numbers = #tpu.dot_dimension_numbers<[1], [0], [0], [1], [0, 0, 1, 1], [], []>} : vector<16x128xf32>, vector<128x32xf32>, vector<16x32xf32> -> vector<16x32xf32>
    %174 = vector.broadcast %112 : vector<1x32xf32> to vector<16x32xf32>
    %175 = arith.addf %173, %174 : vector<16x32xf32>
    %176 = arith.addf %167, %175 : vector<16x32xf32>
    %cst_59 = arith.constant dense<0.000000e+00> : vector<16xf32>
    %177 = vector.multi_reduction <add>, %176, %cst_59 [1] : vector<16x32xf32> to vector<16xf32>
    %178 = vector.shape_cast %177 : vector<16xf32> to vector<16x1xf32>
    %cst_60 = arith.constant 3.200000e+01 : f32
    %179 = vector.broadcast %cst_60 : f32 to vector<16x1xf32>
    %180 = arith.divf %178, %179 : vector<16x1xf32>
    %181 = vector.broadcast %180 : vector<16x1xf32> to vector<16x32xf32>
    %182 = arith.subf %176, %181 : vector<16x32xf32>
    %183 = arith.mulf %182, %182 : vector<16x32xf32>
    %cst_61 = arith.constant dense<0.000000e+00> : vector<16xf32>
    %184 = vector.multi_reduction <add>, %183, %cst_61 [1] : vector<16x32xf32> to vector<16xf32>
    %185 = vector.shape_cast %184 : vector<16xf32> to vector<16x1xf32>
    %cst_62 = arith.constant 3.200000e+01 : f32
    %186 = vector.broadcast %cst_62 : f32 to vector<16x1xf32>
    %187 = arith.divf %185, %186 : vector<16x1xf32>
    %188 = vector.broadcast %180 : vector<16x1xf32> to vector<16x32xf32>
    %189 = arith.subf %176, %188 : vector<16x32xf32>
    %cst_63 = arith.constant 9.99999974E-6 : f32
    %190 = vector.broadcast %cst_63 : f32 to vector<16x1xf32>
    %191 = arith.addf %187, %190 : vector<16x1xf32>
    %192 = math.rsqrt %191 : vector<16x1xf32>
    %193 = vector.broadcast %192 : vector<16x1xf32> to vector<16x32xf32>
    %194 = arith.mulf %189, %193 : vector<16x32xf32>
    %195 = vector.broadcast %113 : vector<1x32xf32> to vector<16x32xf32>
    %196 = arith.mulf %194, %195 : vector<16x32xf32>
    %197 = vector.broadcast %114 : vector<1x32xf32> to vector<16x32xf32>
    %198 = arith.addf %196, %197 : vector<16x32xf32>
    %c496 = arith.constant 496 : index
    %c0_64 = arith.constant 0 : index
    %199 = vector.load %arg2[%c496, %c0_64] : memref<648x128xf32, #tpu.memory_space<vmem>>, vector<8x128xf32>
    %200 = vector.extract_strided_slice %199 {offsets = [0, 0], sizes = [1, 32], strides = [1, 1]} : vector<8x128xf32> to vector<1x32xf32>
    %201 = vector.extract_strided_slice %199 {offsets = [1, 0], sizes = [1, 32], strides = [1, 1]} : vector<8x128xf32> to vector<1x32xf32>
    %202 = vector.extract_strided_slice %199 {offsets = [2, 0], sizes = [1, 32], strides = [1, 1]} : vector<8x128xf32> to vector<1x32xf32>
    %203 = vector.extract_strided_slice %199 {offsets = [3, 0], sizes = [1, 1], strides = [1, 1]} : vector<8x128xf32> to vector<1x1xf32>
    %cst_65 = arith.constant dense<0.000000e+00> : vector<16xf32>
    %204 = vector.multi_reduction <add>, %198, %cst_65 [1] : vector<16x32xf32> to vector<16xf32>
    %205 = vector.shape_cast %204 : vector<16xf32> to vector<16x1xf32>
    %cst_66 = arith.constant 3.200000e+01 : f32
    %206 = vector.broadcast %cst_66 : f32 to vector<16x1xf32>
    %207 = arith.divf %205, %206 : vector<16x1xf32>
    %208 = vector.broadcast %207 : vector<16x1xf32> to vector<16x32xf32>
    %209 = arith.subf %198, %208 : vector<16x32xf32>
    %210 = arith.mulf %209, %209 : vector<16x32xf32>
    %cst_67 = arith.constant dense<0.000000e+00> : vector<16xf32>
    %211 = vector.multi_reduction <add>, %210, %cst_67 [1] : vector<16x32xf32> to vector<16xf32>
    %212 = vector.shape_cast %211 : vector<16xf32> to vector<16x1xf32>
    %cst_68 = arith.constant 3.200000e+01 : f32
    %213 = vector.broadcast %cst_68 : f32 to vector<16x1xf32>
    %214 = arith.divf %212, %213 : vector<16x1xf32>
    %215 = vector.broadcast %207 : vector<16x1xf32> to vector<16x32xf32>
    %216 = arith.subf %198, %215 : vector<16x32xf32>
    %cst_69 = arith.constant 9.99999974E-6 : f32
    %217 = vector.broadcast %cst_69 : f32 to vector<16x1xf32>
    %218 = arith.addf %214, %217 : vector<16x1xf32>
    %219 = math.rsqrt %218 : vector<16x1xf32>
    %220 = vector.broadcast %219 : vector<16x1xf32> to vector<16x32xf32>
    %221 = arith.mulf %216, %220 : vector<16x32xf32>
    %222 = vector.broadcast %200 : vector<1x32xf32> to vector<16x32xf32>
    %223 = arith.mulf %221, %222 : vector<16x32xf32>
    %224 = vector.broadcast %201 : vector<1x32xf32> to vector<16x32xf32>
    %225 = arith.addf %223, %224 : vector<16x32xf32>
    %cst_70 = arith.constant dense<0.000000e+00> : vector<1x16xf32>
    %226 = tpu.matmul %202, %225, %cst_70 {dimension_numbers = #tpu.dot_dimension_numbers<[1], [1], [0], [0], [0, 0, 1, 0], [], []>} : vector<1x32xf32>, vector<16x32xf32>, vector<1x16xf32> -> vector<1x16xf32>
    %227 = vector.broadcast %203 : vector<1x1xf32> to vector<1x16xf32>
    %228 = arith.addf %226, %227 : vector<1x16xf32>
    %c0_71 = arith.constant 0 : index
    %c0_72 = arith.constant 0 : index
    %229 = vector.load %arg3[%c0_71, %c0_72] : memref<1x16xf32, #tpu.memory_space<vmem>>, vector<1x16xf32>
    tpu.vector_store %arg3[%c0_71, %c0_72], %228 {strides = array<i32>} : memref<1x16xf32, #tpu.memory_space<vmem>>, vector<1x16xf32>,
    return
  }
  func.func @transform_0(%arg0: i32) -> (i32, i32) {
    %c0_i32 = arith.constant 0 : i32
    %c0_i32_0 = arith.constant 0 : i32
    %c0_i32_1 = arith.constant 0 : i32
    return %c0_i32, %c0_i32_0 : i32, i32
  }
  func.func @transform_1(%arg0: i32) -> (i32, i32) {
    %c0_i32 = arith.constant 0 : i32
    %c0_i32_0 = arith.constant 0 : i32
    %c0_i32_1 = arith.constant 0 : i32
    return %c0_i32, %c0_i32_0 : i32, i32
  }
  func.func @transform_2(%arg0: i32) -> (i32, i32) {
    %c0_i32 = arith.constant 0 : i32
    %c0_i32_0 = arith.constant 0 : i32
    %c0_i32_1 = arith.constant 0 : i32
    return %c0_i32, %c0_i32_0 : i32, i32
  }
}

</mosaic_0001>

<bundles_post_ra>
// kernel: tpu_custom_call.1
= control target key start
LH: loop header
LB: loop body
LE: loop exit
PB: predicated region body
PF: predicated region fallthrough
CT: control target
= control target key end

     0   :  { %7 = vsyncpa [#allocation3], 0  ;;  %s4498_s0 = inlined_call_operand.hbm [shape: f32[16,16], index: 0, kind: input, shape index: {}]   ;;  %s4499_s1 = inlined_call_operand.hbm [shape: f32[648,128], index: 1, kind: input, shape index: {}]   ;;  %s4500_s2 = inlined_call_operand.hbm [shape: f32[1,16], index: 2, kind: output, shape index: {}]  }
   0x1   :  { %8 = vsyncpa [#allocation6], 0 }
   0x2   :  { %9 = vsyncpa [#allocation4], 0  ;;  %s3884_s9 = smov [#allocation2]   ;;  %s3812_s13 = scalar_lea.hbm %s4498_s0, 256 }
   0x3   :  { %s15_s10 = sshll.u32 %s3884_s9, 4  ;;  %p3813_p0 = scmp.ne.s32.totalorder %s4498_s0, %s3812_s13  ;;  %s16_s10 = int_to_ptr.vmem [resolvable:$true] %s15_s10 }
   0x4   :  { %p3816_p1 = scmp.lt.u32.totalorder %s3812_s13, %s4498_s0 }
   0x6   :  { %p3818_p2 = pnand %p3816_p1, %p3813_p0 }
   0x8   :  { %3821 = shalt.err (!%p3818_p2)
}
   0x9   :  { %s3822_s18 = scalar_lea.vmem %s16_s10, 256  ;;  %p3827_p4 = scmp.lt.s32.totalorder %s16_s10, %s16_s10 }
   0xa   :  { %p3823_p3 = scmp.ne.s32.totalorder %s16_s10, %s3822_s18  ;;  %p3828_p5 = scmp.lt.s32.totalorder %s3822_s18, %s3822_s18 }
   0xc   :  { %p3829_p6 = por %p3828_p5, %p3827_p4 }
   0xe   :  { %p3830_p7 = pnand %p3829_p6, %p3823_p3 }
  0x10   :  { %3833 = shalt.err (!%p3830_p7)
}
  0x11   :  { %s3885_s19 = smov 128   ;;  %s3886_s20 = smov 8  }
  0x12   :  { %21 = dma.hbm_to_vmem [thread:$0]  %s4498_s0, 256, %s16_s10, [#allocation3], %s3885_s19, %s3885_s19, %s3886_s20  }
  0x13   :  { %s3887_s23 = smov [#allocation5]   ;;  %s3834_s27 = scalar_lea.hbm %s4499_s1, 10368 }
  0x14   :  { %s27_s24 = sshll.u32 %s3887_s23, 4  ;;  %p3835_p8 = scmp.ne.s32.totalorder %s4499_s1, %s3834_s27  ;;  %s28_s24 = int_to_ptr.vmem [resolvable:$true] %s27_s24 }
  0x15   :  { %p3838_p9 = scmp.lt.u32.totalorder %s3834_s27, %s4499_s1 }
  0x17   :  { %p3840_p10 = pnand %p3838_p9, %p3835_p8 }
  0x19   :  { %3843 = shalt.err (!%p3840_p10)
}
  0x1a   :  { %s3844_s4 = scalar_lea.vmem %s28_s24, 10368  ;;  %p3849_p12 = scmp.lt.s32.totalorder %s28_s24, %s28_s24 }
  0x1b   :  { %p3845_p11 = scmp.ne.s32.totalorder %s28_s24, %s3844_s4  ;;  %p3850_p13 = scmp.lt.s32.totalorder %s3844_s4, %s3844_s4 }
  0x1d   :  { %p3851_p0 = por %p3850_p13, %p3849_p12 }
  0x1f   :  { %p3852_p1 = pnand %p3851_p0, %p3845_p11 }
  0x21   :  { %3855 = shalt.err (!%p3852_p1)
}
  0x22   :  { %33 = dma.hbm_to_vmem [thread:$0]  %s4499_s1, 10368, %s28_s24, [#allocation6], %s3885_s19, %s3885_s19, %s3886_s20  }
  0x23   :  { %3878 = dma.done.wait [#allocation3], 256  }
  0x24   :  { %3879 = vsyncadd [#allocation3], 4294967040 }
  0x25   :  { %3880 = dma.done.wait [#allocation6], 10368  }
  0x26   :  { %3881 = vsyncadd [#allocation6], 4294956928  ;;  %vm46_vm0 = vcmask 130048   ;;  %v40_v0 = vld [vmem:[#allocation5 + $0x1d0] sm:$0xff]  ;;  %v41_v1 = vld [vmem:[#allocation5 + $0x1d8] sm:$0xff]  ;;  %s3888_s1 = smov 96   ;;  %v175_v25 = vlaneseq }
  0x27   :  { %v44_v2 = vld [vmem:[#allocation2] sm:$0xff]  ;;  %v3370_v3 = vpack.c.bf16 %v41_v1, %v40_v0  ;;  %v128_v4 = vld [vmem:[#allocation5] sm:$0xff]  ;;  %v129_v5 = vld [vmem:[#allocation5 + $0x8] sm:$0xff]  ;;  %vm179_vm1 = vcmask 261120   ;;  %s3889_s6 = smov 64   ;;  %vm3891_vm3 = vmmov 0  }
  0x28   :  { %2902 = vmatprep.mubr.msk.f32.mxu0 %vm46_vm0, %v44_v2  ;;  %v3374_v6 = vpack.c.bf16 %v129_v5, %v128_v4  ;;  %v45_v7 = vld [vmem:[#allocation2 + $0x8] sm:$0xff]  ;;  %v130_v8 = vld [vmem:[#allocation5 + $0x10] sm:$0xff]  ;;  %v3936_v11 = vld [vmem:[#allocation5 + $0x200] sm:$0xff]  ;;  %v3976_v26 = vshrl.u32 %v175_v25, 7  ;;  %s3894_s7 = smov [#allocation7]   ;;  %vm2504_vm4 = vcmask 122880  }
  0x29   :  { %3371 = vmatprep.subr.bf16.mxu0 %v3370_v3  ;;  %v131_v9 = vld [vmem:[#allocation5 + $0x18] sm:$0xff]  ;;  %279 = vrot.lane.b32.xlu1 %v3936_v11, %s3888_s1  ;;  %v3940_v12 = vld [vmem:[#allocation5 + $0x208] sm:$0xff]  ;;  %v42_v18 = vld [vmem:[#allocation5 + $0x1e0] sm:$0xff]  ;;  %s2512_s8 = sshll.u32 %s3894_s7, 4  ;;  %s2513_s8 = int_to_ptr.vmem [resolvable:$true] %s2512_s8 }
  0x2a   :  { %3373 = vmatpush3.bf16.msra.mxu0 %v3370_v3  ;;  %v3378_v10 = vpack.c.bf16 %v131_v9, %v130_v8  ;;  %v3944_v13 = vld [vmem:[#allocation5 + $0x218] sm:$0xff]  ;;  %v3948_v14 = vld [vmem:[#allocation5 + $0x228] sm:$0xff]  ;;  %v3979_v27 = vsub.s32 0, %v3976_v26  ;;  %v3981_v28 = vld [vmem:[#allocation5 + $0xe0] sm:$0xff]  ;;  %s3856_s9 = scalar_lea.vmem %s2513_s8, 16  ;;  %s3860_s10 = scalar_lea.vmem %s2513_s8, 32 }
  0x2b   :  { %3375 = vmatprep.subr.bf16.mxu0 %v3374_v6  ;;  %v3952_v15 = vld [vmem:[#allocation5 + $0x238] sm:$0xff]  ;;  %v3956_v16 = vld [vmem:[#allocation5 + $0x248] sm:$0xff]  ;;  %v3997_v36 = vld [vmem:[#allocation5 + $0x210] sm:$0xff]  ;;  %p3857_p2 = scmp.ne.s32.totalorder %s2513_s8, %s3856_s9  ;;  %p3861_p3 = scmp.lt.s32.totalorder %s2513_s8, %s2513_s8 }
  0x2c   :  { %v3960_v17 = vld [vmem:[#allocation5 + $0x258] sm:$0xff]  ;;  %v43_v19 = vld [vmem:[#allocation5 + $0x1e8] sm:$0xff]  ;;  %v178_v29 = vrot.slane %v3981_v28, %v3979_v27  ;;  %v4001_v37 = vld [vmem:[#allocation5 + $0x220] sm:$0xff]  ;;  %p3862_p4 = scmp.lt.s32.totalorder %s3860_s10, %s3856_s9 }
  0x2d   :  { %2903 = vmatmul.mubr.msk.f32.vlgmr.msra.gmra.mrb[0].mxu0 %vm46_vm0, %v45_v7  ;;  %281 = vrot.lane.b32.xlu1 %v3940_v12, %s3888_s1  ;;  %v3972_v24 = vld [vmem:[#allocation5 + $0x268] sm:$0xff]  ;;  %v3993_v35 = vld [vmem:[#allocation5 + $0x1f8] sm:$0xff]  ;;  %v4005_v38 = vld [vmem:[#allocation5 + $0x230] sm:$0xff] }
  0x2e   :  { %3377 = vmatpush3.bf16.msra.mxu0 %v3374_v6  ;;  %v4009_v39 = vld [vmem:[#allocation5 + $0x240] sm:$0xff]  ;;  %v4013_v40 = vld [vmem:[#allocation5 + $0x250] sm:$0xff]  ;;  %vm4129_vm2 = vmpackc.low %vm179_vm1, %vm179_vm1  ;;  %p3863_p5 = por %p3862_p4, %p3861_p3 }
  0x2f   :  { %3379 = vmatprep.subr.bf16.mxu0 %v3378_v10  ;;  %v4017_v41 = vld [vmem:[#allocation5 + $0x260] sm:$0xff]  ;;  %v4021_v42 = vld [vmem:[#allocation5 + $0x270] sm:$0xff] }
  0x30   :  { %p3864_p6 = pnand %p3863_p5, %p3857_p2 }
  0x31   :  { %285 = vrot.lane.b32.xlu1 %v3944_v13, %s3888_s1 }
  0x32   :  { %3381 = vmatpush3.bf16.msra.mxu0 %v3378_v10 }
  0x35   :  { %289 = vrot.lane.b32.xlu1 %v3948_v14, %s3888_s1 }
  0x39   :  { %293 = vrot.lane.b32.xlu1 %v3952_v15, %s3888_s1 }
  0x3d   :  { %297 = vrot.lane.b32.xlu1 %v3956_v16, %s3888_s1 }
  0x41   :  { %301 = vrot.lane.b32.xlu1 %v3960_v17, %s3888_s1 }
  0x45   :  { %305 = vrot.lane.b32.xlu1 %v3972_v24, %s3888_s1 }
  0x9b   :  { %v4025_v43 = vpop.permute.xlu1 %279 }
  0x9f   :  { %v4027_v44 = vpop.permute.xlu1 %281 }
  0xa3   :  { %v4029_v45 = vpop.permute.xlu1 %285 }
  0xa7   :  { %v4031_v46 = vpop.permute.xlu1 %289 }
  0xab   :  { %v4033_v47 = vpop.permute.xlu1 %293 }
  0xaf   :  { %v4035_v48 = vpop.permute.xlu1 %297 }
  0xb3   :  { %v4037_v49 = vpop.permute.xlu1 %301 }
  0xb7   :  { %v4039_v50 = vpop.permute.xlu1 %305 }
 0x100   :  { %v2904_v20 = vpop.f32.mrb[0].mxu0 }
 0x101   :  { %v119_v21 = vpop.f32.mrb[1].mxu0  ;;  %v3966_v23 = vadd.f32 %v2904_v20, %v43_v19 }
 0x102   :  { %v3964_v22 = vadd.f32 %v119_v21, %v42_v18 }
 0x104   :  { %2913 = vmatprep.mubr.msk.f32.mxu0 %vm179_vm1, %v3964_v22 }
 0x105   :  { %2914 = vmatmul.mubr.msk.f32.vlgmr.msra.gmra.mrb[2].mxu0 %vm179_vm1, %v3966_v23 }
 0x1d8   :  { %v2915_v30 = vpop.f32.mrb[2].mxu0 }
 0x1d9   :  { %v3985_v31 = vadd.f32 %v2915_v30, %v178_v29  ;;  %v252_v32 = vpop.f32.mrb[3].mxu0 }
 0x1da   :  { %v3987_v33 = vadd.f32 %v252_v32, %v178_v29 }
 0x1dc   :  { %v3746_v34 = vpack.i.bf16 %v3985_v31, %v3987_v33 }
 0x1de   :  { %3747 = vrot.lane.b32.xlu1 %v3746_v34, %s3889_s6  ;;  %3742 = vrot.lane.b32.xlu0 %v3746_v34, %s3888_s1 }
 0x1e2   :  { %277 = vrot.lane.b32.xlu0 %v3993_v35, %s3888_s1 }
 0x1e6   :  { %283 = vrot.lane.b32.xlu0 %v3997_v36, %s3888_s1 }
 0x1ea   :  { %287 = vrot.lane.b32.xlu0 %v4001_v37, %s3888_s1 }
 0x1ee   :  { %291 = vrot.lane.b32.xlu0 %v4005_v38, %s3888_s1 }
 0x1f2   :  { %295 = vrot.lane.b32.xlu0 %v4009_v39, %s3888_s1 }
 0x1f6   :  { %299 = vrot.lane.b32.xlu0 %v4013_v40, %s3888_s1 }
 0x1fa   :  { %303 = vrot.lane.b32.xlu0 %v4017_v41, %s3888_s1 }
 0x1fe   :  { %307 = vrot.lane.b32.xlu0 %v4021_v42, %s3888_s1 }
 0x250   :  { %v3748_v51 = vpop.permute.xlu1 %3747  ;;  %v3743_v52 = vpop.permute.xlu0 %3742 }
 0x251   :  { %v3750_v53 = vunpack.i.h.bf16 %v3748_v51  ;;  %v3749_v54 = vunpack.i.l.bf16 %v3748_v51  ;;  %v3745_v55 = vunpack.i.h.bf16 %v3743_v52  ;;  %v3744_v56 = vunpack.i.l.bf16 %v3743_v52 }
 0x253   :  { %v3382_v57 = vpack.c.bf16 %v3745_v55, %v3744_v56  ;;  %v3386_v58 = vpack.c.bf16 %v3750_v53, %v3749_v54 }
 0x254   :  { %v4041_v59 = vpop.permute.xlu0 %277 }
 0x255   :  { %3383 = vmatprep.subr.bf16.mxu0 %v3382_v57  ;;  %3387 = vmatprep.subr.bf16.mxu1 %v3386_v58 }
 0x256   :  { %3385 = vmatpush3.bf16.msra.mxu0 %v3382_v57  ;;  %3389 = vmatpush3.bf16.msra.mxu1 %v3386_v58 }
 0x257   :  { %2920 = vmatprep.mubr.msk.f32.mxu0 %vm46_vm0, %v4041_v59  ;;  %2948 = vmatprep.mubr.msk.f32.mxu1 %vm46_vm0, %v4041_v59 }
 0x258   :  { %v4047_v60 = vpop.permute.xlu0 %283 }
 0x259   :  { %2921 = vmatmul.mubr.msk.f32.vlgmr.msra.gmra.mrb[4].mxu0 %vm46_vm0, %v4025_v43  ;;  %2949 = vmatmul.mubr.msk.f32.vlgmr.msra.gmra.mrb[0].mxu1 %vm46_vm0, %v4025_v43 }
 0x25a   :  { %2923 = vmatprep.mubr.msk.f32.mxu0 %vm46_vm0, %v4027_v44  ;;  %2951 = vmatprep.mubr.msk.f32.mxu1 %vm46_vm0, %v4027_v44 }
 0x25c   :  { %v4057_v61 = vpop.permute.xlu0 %287 }
 0x25d   :  { %2924 = vmatmul.mubr.msk.f32.gmra.mrb[6].mxu0 %vm46_vm0, %v4047_v60  ;;  %2952 = vmatmul.mubr.msk.f32.gmra.mrb[2].mxu1 %vm46_vm0, %v4047_v60 }
 0x25e   :  { %2926 = vmatprep.mubr.msk.f32.mxu0 %vm46_vm0, %v4029_v45  ;;  %2954 = vmatprep.mubr.msk.f32.mxu1 %vm46_vm0, %v4029_v45 }
 0x260   :  { %v4067_v62 = vpop.permute.xlu0 %291 }
 0x261   :  { %2927 = vmatmul.mubr.msk.f32.gmra.mrb[8].mxu0 %vm46_vm0, %v4057_v61  ;;  %2955 = vmatmul.mubr.msk.f32.gmra.mrb[4].mxu1 %vm46_vm0, %v4057_v61 }
 0x262   :  { %2929 = vmatprep.mubr.msk.f32.mxu0 %vm46_vm0, %v4031_v46  ;;  %2957 = vmatprep.mubr.msk.f32.mxu1 %vm46_vm0, %v4031_v46 }
 0x264   :  { %v4077_v63 = vpop.permute.xlu0 %295 }
 0x265   :  { %2930 = vmatmul.mubr.msk.f32.gmra.mrb[10].mxu0 %vm46_vm0, %v4067_v62  ;;  %2958 = vmatmul.mubr.msk.f32.gmra.mrb[6].mxu1 %vm46_vm0, %v4067_v62 }
 0x266   :  { %2932 = vmatprep.mubr.msk.f32.mxu0 %vm46_vm0, %v4033_v47  ;;  %2960 = vmatprep.mubr.msk.f32.mxu1 %vm46_vm0, %v4033_v47 }
 0x268   :  { %v4087_v0 = vpop.permute.xlu0 %299 }
 0x269   :  { %2933 = vmatmul.mubr.msk.f32.gmra.mrb[12].mxu0 %vm46_vm0, %v4077_v63  ;;  %2961 = vmatmul.mubr.msk.f32.gmra.mrb[8].mxu1 %vm46_vm0, %v4077_v63 }
 0x26a   :  { %2935 = vmatprep.mubr.msk.f32.mxu0 %vm46_vm0, %v4035_v48  ;;  %2963 = vmatprep.mubr.msk.f32.mxu1 %vm46_vm0, %v4035_v48 }
 0x26c   :  { %v4097_v1 = vpop.permute.xlu0 %303 }
 0x26d   :  { %2936 = vmatmul.mubr.msk.f32.gmra.mrb[14].mxu0 %vm46_vm0, %v4087_v0  ;;  %2964 = vmatmul.mubr.msk.f32.gmra.mrb[10].mxu1 %vm46_vm0, %v4087_v0 }
 0x26e   :  { %2938 = vmatprep.mubr.msk.f32.mxu0 %vm46_vm0, %v4037_v49  ;;  %2966 = vmatprep.mubr.msk.f32.mxu1 %vm46_vm0, %v4037_v49 }
 0x270   :  { %v4111_v2 = vpop.permute.xlu0 %307 }
 0x271   :  { %2939 = vmatmul.mubr.msk.f32.gmra.mrb[16].mxu0 %vm46_vm0, %v4097_v1  ;;  %2967 = vmatmul.mubr.msk.f32.gmra.mrb[12].mxu1 %vm46_vm0, %v4097_v1 }
 0x272   :  { %2941 = vmatprep.mubr.msk.f32.mxu0 %vm46_vm0, %v4039_v50  ;;  %2969 = vmatprep.mubr.msk.f32.mxu1 %vm46_vm0, %v4039_v50 }
 0x275   :  { %2942 = vmatmul.mubr.msk.f32.gmra.mrb[18].mxu0 %vm46_vm0, %v4111_v2  ;;  %2970 = vmatmul.mubr.msk.f32.gmra.mrb[14].mxu1 %vm46_vm0, %v4111_v2 }
 0x276   :  { %3004 = vmatprep.mubr.msk.f32.mxu0 %vm179_vm1, %v3987_v33 }
 0x32c   :  { %v2922_v3 = vpop.f32.mrb[4].mxu0  ;;  %v2950_v4 = vpop.f32.mrb[0].mxu1 }
 0x32d   :  { %v495_v5 = vmul.f32 %v2922_v3, %v3936_v11  ;;  %v662_v6 = vmul.f32 %v2950_v4, %v3936_v11  ;;  %v415_v7 = vpop.f32.mrb[5].mxu0  ;;  %v582_v8 = vpop.f32.mrb[1].mxu1 }
 0x32e   :  { %v494_v9 = vmul.f32 %v415_v7, %v3993_v35  ;;  %v661_v10 = vmul.f32 %v582_v8, %v3993_v35 }
 0x330   :  { %v3390_v19 = vpack.c.bf16 %v495_v5, %v494_v9  ;;  %v3438_v20 = vpack.c.bf16 %v662_v6, %v661_v10  ;;  %v2953_v21 = vpop.f32.mrb[2].mxu1  ;;  %v2925_v25 = vpop.f32.mrb[6].mxu0 }
 0x331   :  { %v664_v29 = vmul.f32 %v2953_v21, %v3997_v36  ;;  %v497_v30 = vmul.f32 %v2925_v25, %v3997_v36  ;;  %v592_v32 = vpop.f32.mrb[3].mxu1  ;;  %v425_v33 = vpop.f32.mrb[7].mxu0 }
 0x332   :  { %3392 = vmatprep.subr.msk.bf16.mxu0 %vm4129_vm2, %v3390_v19  ;;  %3439 = vmatprep.subr.bf16.mxu1 %v3438_v20  ;;  %v663_v34 = vmul.f32 %v592_v32, %v3940_v12  ;;  %v496_v51 = vmul.f32 %v425_v33, %v3940_v12 }
 0x333   :  { %3395 = vmatpush3.bf16.xpose.msk.msra.mxu0 %vm4129_vm2, %v3390_v19  ;;  %3441 = vmatpush3.bf16.msra.mxu1 %v3438_v20 }
 0x334   :  { %v3442_v52 = vpack.c.bf16 %v664_v29, %v663_v34  ;;  %v3396_v53 = vpack.c.bf16 %v497_v30, %v496_v51  ;;  %v2956_v54 = vpop.f32.mrb[4].mxu1  ;;  %v2928_v55 = vpop.f32.mrb[8].mxu0 }
 0x335   :  { %v666_v56 = vmul.f32 %v2956_v54, %v4001_v37  ;;  %v499_v57 = vmul.f32 %v2928_v55, %v4001_v37  ;;  %v602_v58 = vpop.f32.mrb[5].mxu1  ;;  %v435_v3 = vpop.f32.mrb[9].mxu0 }
 0x336   :  { %3443 = vmatprep.subr.bf16.mxu1 %v3442_v52  ;;  %3398 = vmatprep.subr.msk.bf16.mxu0 %vm4129_vm2, %v3396_v53  ;;  %v665_v4 = vmul.f32 %v602_v58, %v3944_v13  ;;  %v498_v5 = vmul.f32 %v435_v3, %v3944_v13 }
 0x337   :  { %3445 = vmatpush3.bf16.msra.mxu1 %v3442_v52 }
 0x338   :  { %v3446_v6 = vpack.c.bf16 %v666_v56, %v665_v4  ;;  %v3402_v7 = vpack.c.bf16 %v499_v57, %v498_v5  ;;  %v2959_v8 = vpop.f32.mrb[6].mxu1  ;;  %v2931_v9 = vpop.f32.mrb[10].mxu0 }
 0x339   :  { %v668_v10 = vmul.f32 %v2959_v8, %v4005_v38  ;;  %v501_v19 = vmul.f32 %v2931_v9, %v4005_v38  ;;  %v612_v20 = vpop.f32.mrb[7].mxu1  ;;  %v445_v21 = vpop.f32.mrb[11].mxu0 }
 0x33a   :  { %3447 = vmatprep.subr.bf16.mxu1 %v3446_v6  ;;  %v667_v25 = vmul.f32 %v612_v20, %v3948_v14  ;;  %v500_v29 = vmul.f32 %v445_v21, %v3948_v14 }
 0x33b   :  { %3401 = vmatpush3.bf16.xpose.msk.msra.mxu0 %vm4129_vm2, %v3396_v53  ;;  %3449 = vmatpush3.bf16.msra.mxu1 %v3446_v6 }
 0x33c   :  { %3404 = vmatprep.subr.msk.bf16.mxu0 %vm4129_vm2, %v3402_v7  ;;  %v3450_v30 = vpack.c.bf16 %v668_v10, %v667_v25  ;;  %v3408_v32 = vpack.c.bf16 %v501_v19, %v500_v29  ;;  %v2962_v33 = vpop.f32.mrb[8].mxu1  ;;  %v2934_v34 = vpop.f32.mrb[12].mxu0 }
 0x33d   :  { %v670_v51 = vmul.f32 %v2962_v33, %v4009_v39  ;;  %v503_v52 = vmul.f32 %v2934_v34, %v4009_v39  ;;  %v622_v54 = vpop.f32.mrb[9].mxu1  ;;  %v455_v55 = vpop.f32.mrb[13].mxu0 }
 0x33e   :  { %3451 = vmatprep.subr.bf16.mxu1 %v3450_v30  ;;  %v669_v56 = vmul.f32 %v622_v54, %v3952_v15  ;;  %v502_v57 = vmul.f32 %v455_v55, %v3952_v15 }
 0x33f   :  { %3453 = vmatpush3.bf16.msra.mxu1 %v3450_v30 }
 0x340   :  { %v3454_v53 = vpack.c.bf16 %v670_v51, %v669_v56  ;;  %v3414_v58 = vpack.c.bf16 %v503_v52, %v502_v57  ;;  %v2965_v3 = vpop.f32.mrb[10].mxu1  ;;  %v2937_v4 = vpop.f32.mrb[14].mxu0 }
 0x341   :  { %v672_v5 = vmul.f32 %v2965_v3, %v4013_v40  ;;  %v505_v6 = vmul.f32 %v2937_v4, %v4013_v40  ;;  %v632_v8 = vpop.f32.mrb[11].mxu1  ;;  %v465_v9 = vpop.f32.mrb[15].mxu0 }
 0x342   :  { %3455 = vmatprep.subr.bf16.mxu1 %v3454_v53  ;;  %v671_v10 = vmul.f32 %v632_v8, %v3956_v16  ;;  %v504_v19 = vmul.f32 %v465_v9, %v3956_v16 }
 0x343   :  { %3407 = vmatpush3.bf16.xpose.msk.msra.mxu0 %vm4129_vm2, %v3402_v7  ;;  %3457 = vmatpush3.bf16.msra.mxu1 %v3454_v53 }
 0x344   :  { %3410 = vmatprep.subr.msk.bf16.mxu0 %vm4129_vm2, %v3408_v32  ;;  %v3458_v20 = vpack.c.bf16 %v672_v5, %v671_v10  ;;  %v3420_v21 = vpack.c.bf16 %v505_v6, %v504_v19  ;;  %v2968_v25 = vpop.f32.mrb[12].mxu1  ;;  %v2940_v29 = vpop.f32.mrb[16].mxu0 }
 0x345   :  { %v674_v30 = vmul.f32 %v2968_v25, %v4017_v41  ;;  %v507_v33 = vmul.f32 %v2940_v29, %v4017_v41  ;;  %v642_v34 = vpop.f32.mrb[13].mxu1  ;;  %v475_v51 = vpop.f32.mrb[17].mxu0 }
 0x346   :  { %3459 = vmatprep.subr.bf16.mxu1 %v3458_v20  ;;  %v673_v52 = vmul.f32 %v642_v34, %v3960_v17  ;;  %v506_v54 = vmul.f32 %v475_v51, %v3960_v17 }
 0x347   :  { %3461 = vmatpush3.bf16.msra.mxu1 %v3458_v20 }
 0x348   :  { %v3462_v7 = vpack.c.bf16 %v674_v30, %v673_v52  ;;  %v3426_v55 = vpack.c.bf16 %v507_v33, %v506_v54  ;;  %v2971_v56 = vpop.f32.mrb[14].mxu1  ;;  %v2943_v57 = vpop.f32.mrb[18].mxu0  ;;  %v4202_v54 = vld [vmem:[#allocation5 + $0x280] sm:$0xff] }
 0x349   :  { %v676_v53 = vmul.f32 %v2971_v56, %v4021_v42  ;;  %v509_v3 = vmul.f32 %v2943_v57, %v4021_v42  ;;  %v652_v4 = vpop.f32.mrb[15].mxu1  ;;  %v485_v5 = vpop.f32.mrb[19].mxu0  ;;  %v4208_v56 = vpack.c.bf16 %v3997_v36, %v3940_v12  ;;  %v4214_v57 = vpack.c.bf16 %v4001_v37, %v3944_v13 }
 0x34a   :  { %3463 = vmatprep.subr.bf16.mxu1 %v3462_v7  ;;  %v675_v6 = vmul.f32 %v652_v4, %v3972_v24  ;;  %v508_v8 = vmul.f32 %v485_v5, %v3972_v24  ;;  %v4226_v12 = vpack.c.bf16 %v4009_v39, %v3952_v15  ;;  %v4232_v13 = vpack.c.bf16 %v4013_v40, %v3956_v16  ;;  %v132_v16 = vld [vmem:[#allocation5 + $0x20] sm:$0xff]  ;;  %v133_v39 = vld [vmem:[#allocation5 + $0x28] sm:$0xff] }
 0x34b   :  { %3413 = vmatpush3.bf16.xpose.msk.msra.mxu0 %vm4129_vm2, %v3408_v32  ;;  %3465 = vmatpush3.bf16.msra.mxu1 %v3462_v7  ;;  %v4244_v15 = vpack.c.bf16 %v4021_v42, %v3972_v24  ;;  %v3502_v40 = vpack.c.bf16 %v133_v39, %v132_v16 }
 0x34c   :  { %3416 = vmatprep.subr.msk.bf16.mxu0 %vm4129_vm2, %v3414_v58  ;;  %v3466_v9 = vpack.c.bf16 %v676_v53, %v675_v6  ;;  %v3432_v10 = vpack.c.bf16 %v509_v3, %v508_v8  ;;  %v4220_v53 = vpack.c.bf16 %v4005_v38, %v3948_v14  ;;  %v4238_v14 = vpack.c.bf16 %v4017_v41, %v3960_v17  ;;  %v134_v17 = vld [vmem:[#allocation5 + $0x30] sm:$0xff]  ;;  %v135_v41 = vld [vmem:[#allocation5 + $0x38] sm:$0xff] }
 0x34d   :  { %v3506_v3 = vpack.c.bf16 %v135_v41, %v134_v17  ;;  %v136_v41 = vld [vmem:[#allocation5 + $0x40] sm:$0xff] }
 0x34e   :  { %3467 = vmatprep.subr.bf16.mxu1 %v3466_v9 }
 0x34f   :  { %3469 = vmatpush3.bf16.msra.mxu1 %v3466_v9 }
 0x353   :  { %3419 = vmatpush3.bf16.xpose.msk.msra.mxu0 %vm4129_vm2, %v3414_v58 }
 0x354   :  { %3422 = vmatprep.subr.msk.bf16.mxu0 %vm4129_vm2, %v3420_v21 }
 0x35b   :  { %3425 = vmatpush3.bf16.xpose.msk.msra.mxu0 %vm4129_vm2, %v3420_v21  ;;  %v4197_v21 = vpack.c.bf16 %v3936_v11, %v3993_v35 }
 0x35c   :  { %3428 = vmatprep.subr.msk.bf16.mxu0 %vm4129_vm2, %v3426_v55 }
 0x35d   :  { %3471 = vmatprep.subr.bf16.mxu1 %v4197_v21 }
 0x363   :  { %3431 = vmatpush3.bf16.xpose.msk.msra.mxu0 %vm4129_vm2, %v3426_v55 }
 0x364   :  { %3434 = vmatprep.subr.msk.bf16.mxu0 %vm4129_vm2, %v3432_v10 }
 0x36b   :  { %3437 = vmatpush3.bf16.xpose.msk.msra.mxu0 %vm4129_vm2, %v3432_v10 }
 0x36c   :  { %3503 = vmatprep.subr.bf16.mxu0 %v3502_v40 }
 0x372   :  { %3005 = vmatmul.mubr.msk.f32.vlgmr.msra.gmra.mrb[20].mxu0 %vm179_vm1, %v3985_v31  ;;  %v4200_v31 = vld [vmem:[#allocation5 + $0x278] sm:$0xff] }
 0x373   :  { %3505 = vmatpush3.bf16.msra.mxu0 %v3502_v40 }
 0x374   :  { %3507 = vmatprep.subr.bf16.mxu0 %v3506_v3 }
 0x377   :  { %3509 = vmatpush3.bf16.msra.mxu0 %v3506_v3  ;;  %v137_v3 = vld [vmem:[#allocation5 + $0x48] sm:$0xff] }
 0x445   :  { %v3006_v32 = vpop.f32.mrb[20].mxu0 }
 0x446   :  { %v805_v58 = vmul.f32 0.5, %v3006_v32  ;;  %v795_v19 = vpop.f32.mrb[21].mxu0  ;;  %v4252_v32 = vsub.s32 1, %v3976_v26 }
 0x447   :  { %v804_v20 = vmul.f32 0.5, %v795_v19 }
 0x448   :  { %808 = vmax.xlane.f32.xlu1 %v805_v58 }
 0x449   :  { %806 = vmax.xlane.f32.xlu0 %v804_v20 }
 0x4d5   :  { %v809_v25 = vpop.xlane.xlu1 %808 }
 0x4d6   :  { %v811_v29 = vsub.f32 %v805_v58, %v809_v25  ;;  %v807_v30 = vpop.xlane.xlu0 %806  ;;  %v975_v58 = vrot.slane %v3981_v28, %v4252_v32 }
 0x4d7   :  { %v810_v33 = vsub.f32 %v804_v20, %v807_v30 }
 0x4d8   :  { %v814_v34 = vmul.f32 1.442695, %v811_v29 }
 0x4d9   :  { %v812_v51 = vmul.f32 1.442695, %v810_v33 }
 0x4da   :  { %3763 = vpow2.f32 %v814_v34 }
 0x4db   :  { %3765 = vpow2.f32 %v812_v51 }
 0x4e4   :  { %v3764_v52 = vpop.eup %3763 }
 0x4e5   :  { %v3766_v7 = vpop.eup %3765  ;;  %v817_v11 = vmul.f32 %v3764_v52, %v4202_v54 }
 0x4e6   :  { %v816_v55 = vmul.f32 %v3766_v7, %v4200_v31 }
 0x4e8   :  { %3039 = vmatprep.mubr.f32.mxu1 %v816_v55 }
 0x4e9   :  { %3040 = vmatmul.mubr.f32.vlgmr.msra.gmra.mrb[16].mxu1 %v817_v11 }
 0x4ea   :  { %3473 = vmatpush3.bf16.msra.mxu1 %v4197_v21  ;;  %3074 = vmatprep.mubr.f32.mxu1 %v816_v55 }
 0x4eb   :  { %3475 = vmatprep.subr.bf16.mxu1 %v4208_v56 }
 0x4ee   :  { %3477 = vmatpush3.bf16.msra.mxu1 %v4208_v56 }
 0x4ef   :  { %3479 = vmatprep.subr.bf16.mxu1 %v4214_v57 }
 0x4f2   :  { %3481 = vmatpush3.bf16.msra.mxu1 %v4214_v57 }
 0x4f3   :  { %3483 = vmatprep.subr.bf16.mxu1 %v4220_v53 }
 0x4f6   :  { %3485 = vmatpush3.bf16.msra.mxu1 %v4220_v53 }
 0x4f7   :  { %3487 = vmatprep.subr.bf16.mxu1 %v4226_v12 }
 0x4fa   :  { %3489 = vmatpush3.bf16.msra.mxu1 %v4226_v12 }
 0x4fb   :  { %3491 = vmatprep.subr.bf16.mxu1 %v4232_v13 }
 0x4fe   :  { %3493 = vmatpush3.bf16.msra.mxu1 %v4232_v13 }
 0x4ff   :  { %3495 = vmatprep.subr.bf16.mxu1 %v4238_v14 }
 0x502   :  { %3497 = vmatpush3.bf16.msra.mxu1 %v4238_v14 }
 0x503   :  { %3499 = vmatprep.subr.bf16.mxu1 %v4244_v15 }
 0x506   :  { %3501 = vmatpush3.bf16.msra.mxu1 %v4244_v15 }
 0x509   :  { %3075 = vmatmul.mubr.f32.vlgmr.msra.gmra.mrb[18].mxu1 %v817_v11 }
 0x5bc   :  { %v3041_v4 = vpop.f32.mrb[16].mxu1 }
 0x5bd   :  { %v884_v24 = vpop.f32.mrb[17].mxu1 }
 0x5dc   :  { %v3076_v42 = vpop.f32.mrb[18].mxu1 }
 0x5dd   :  { %3767 = vrcp.f32 %v3076_v42  ;;  %v959_v5 = vpop.f32.mrb[19].mxu1  ;;  %v139_v42 = vld [vmem:[#allocation5 + $0x58] sm:$0xff] }
 0x5de   :  { %3769 = vrcp.f32 %v959_v5 }
 0x5e7   :  { %v3768_v6 = vpop.eup %3767 }
 0x5e8   :  { %v3770_v8 = vpop.eup %3769  ;;  %v971_v9 = vmul.f32 %v3768_v6, %v3041_v4  ;;  %v3510_v4 = vpack.c.bf16 %v137_v3, %v136_v41  ;;  %v140_v6 = vld [vmem:[#allocation5 + $0x60] sm:$0xff] }
 0x5e9   :  { %v970_v10 = vmul.f32 %v3770_v8, %v884_v24  ;;  %v138_v24 = vld [vmem:[#allocation5 + $0x50] sm:$0xff]  ;;  %v141_v8 = vld [vmem:[#allocation5 + $0x68] sm:$0xff] }
 0x5ea   :  { %3511 = vmatprep.subr.bf16.mxu1 %v3510_v4  ;;  %v3514_v5 = vpack.c.bf16 %v139_v42, %v138_v24 }
 0x5eb   :  { %3085 = vmatprep.mubr.msk.f32.mxu0 %vm179_vm1, %v970_v10  ;;  %3513 = vmatpush3.bf16.msra.mxu1 %v3510_v4  ;;  %v3518_v10 = vpack.c.bf16 %v141_v8, %v140_v6  ;;  %v1088_v6 = vsub.s32 2, %v3976_v26  ;;  %v1094_v8 = vsub.s32 3, %v3976_v26 }
 0x5ec   :  { %3086 = vmatmul.mubr.msk.f32.vlgmr.msra.gmra.mrb[22].mxu0 %vm179_vm1, %v971_v9  ;;  %3515 = vmatprep.subr.bf16.mxu1 %v3514_v5  ;;  %v142_v9 = vld [vmem:[#allocation5 + $0x70] sm:$0xff] }
 0x5ed   :  { %3519 = vmatprep.subr.bf16.mxu0 %v3518_v10 }
 0x5ee   :  { %3521 = vmatpush3.bf16.msra.mxu0 %v3518_v10 }
 0x5ef   :  { %3517 = vmatpush3.bf16.msra.mxu1 %v3514_v5 }
 0x6bf   :  { %v3087_v19 = vpop.f32.mrb[22].mxu0 }
 0x6c0   :  { %v1048_v20 = vpop.f32.mrb[23].mxu0  ;;  %v1054_v25 = vadd.f32 %v3087_v19, %v975_v58 }
 0x6c1   :  { %v1049_v29 = vadd.f32 %v1048_v20, %v975_v58  ;;  %v143_v58 = vld [vmem:[#allocation5 + $0x78] sm:$0xff]  ;;  %v144_v20 = vld [vmem:[#allocation5 + $0x80] sm:$0xff] }
 0x6c2   :  { %v1058_v34 = vadd.f32 %v1054_v25, %v3966_v23  ;;  %v3522_v19 = vpack.c.bf16 %v143_v58, %v142_v9  ;;  %v145_v25 = vld [vmem:[#allocation5 + $0x88] sm:$0xff]  ;;  %v1089_v9 = vrot.slane %v3981_v28, %v1088_v6 }
 0x6c3   :  { %v1057_v30 = vadd.f32 %v1049_v29, %v3964_v22  ;;  %v3526_v29 = vpack.c.bf16 %v145_v25, %v144_v20 }
 0x6c4   :  { %v1062_v51 = vsel %vm179_vm1, %v1058_v34, 0.0  ;;  %3523 = vmatprep.subr.bf16.mxu0 %v3522_v19 }
 0x6c5   :  { %v1059_v33 = vsel %vm179_vm1, %v1057_v30, 0.0  ;;  %3525 = vmatpush3.bf16.msra.mxu0 %v3522_v19  ;;  %v1095_v19 = vrot.slane %v3981_v28, %v1094_v8 }
 0x6c6   :  { %1060 = vadd.xlane.f32.xlu0 %v1059_v33  ;;  %v147_v33 = vld [vmem:[#allocation5 + $0x98] sm:$0xff]  ;;  %3527 = vmatprep.subr.bf16.mxu0 %v3526_v29 }
 0x6c9   :  { %3529 = vmatpush3.bf16.msra.mxu0 %v3526_v29 }
 0x6ca   :  { %1063 = vadd.xlane.f32.xlu0 %v1062_v51  ;;  %v148_v51 = vld [vmem:[#allocation5 + $0xa0] sm:$0xff] }
 0x753   :  { %v1061_v52 = vpop.xlane.xlu0 %1060 }
 0x754   :  { %v1066_v7 = vmul.f32 0.03125, %v1061_v52  ;;  %v149_v52 = vld [vmem:[#allocation5 + $0xa8] sm:$0xff] }
 0x756   :  { %v4260_v55 = vsub.f32 %v1057_v30, %v1066_v7  ;;  %v146_v30 = vld [vmem:[#allocation5 + $0x90] sm:$0xff]  ;;  %v3534_v7 = vpack.c.bf16 %v149_v52, %v148_v51  ;;  %v155_v52 = vld [vmem:[#allocation5 + $0xd8] sm:$0xff] }
 0x757   :  { %v1064_v11 = vpop.xlane.xlu0 %1063  ;;  %v154_v51 = vld [vmem:[#allocation5 + $0xd0] sm:$0xff] }
 0x758   :  { %v1067_v16 = vmul.f32 0.03125, %v1064_v11  ;;  %v1070_v39 = vmul.f32 %v4260_v55, %v4260_v55  ;;  %v150_v11 = vld [vmem:[#allocation5 + $0xb0] sm:$0xff] }
 0x75a   :  { %v4264_v40 = vsub.f32 %v1058_v34, %v1067_v16  ;;  %v1072_v22 = vsel %vm179_vm1, %v1070_v39, 0.0  ;;  %v3530_v34 = vpack.c.bf16 %v147_v33, %v146_v30  ;;  %v151_v16 = vld [vmem:[#allocation5 + $0xb8] sm:$0xff] }
 0x75b   :  { %1073 = vadd.xlane.f32.xlu1 %v1072_v22  ;;  %v3538_v39 = vpack.c.bf16 %v151_v16, %v150_v11  ;;  %v152_v22 = vld [vmem:[#allocation5 + $0xc0] sm:$0xff] }
 0x75c   :  { %v1071_v23 = vmul.f32 %v4264_v40, %v4264_v40  ;;  %3531 = vmatprep.subr.bf16.mxu0 %v3530_v34 }
 0x75d   :  { %3533 = vmatpush3.bf16.msra.mxu0 %v3530_v34 }
 0x75e   :  { %v1075_v17 = vsel %vm179_vm1, %v1071_v23, 0.0  ;;  %3535 = vmatprep.subr.bf16.mxu0 %v3534_v7  ;;  %v153_v23 = vld [vmem:[#allocation5 + $0xc8] sm:$0xff] }
 0x75f   :  { %1076 = vadd.xlane.f32.xlu0 %v1075_v17  ;;  %v3542_v17 = vpack.c.bf16 %v153_v23, %v152_v22 }
 0x761   :  { %3537 = vmatpush3.bf16.msra.mxu0 %v3534_v7  ;;  %v3546_v7 = vpack.c.bf16 %v155_v52, %v154_v51 }
 0x762   :  { %3539 = vmatprep.subr.bf16.mxu0 %v3538_v39 }
 0x765   :  { %3541 = vmatpush3.bf16.msra.mxu0 %v3538_v39 }
 0x766   :  { %3543 = vmatprep.subr.bf16.mxu0 %v3542_v17 }
 0x769   :  { %3545 = vmatpush3.bf16.msra.mxu0 %v3542_v17 }
 0x76a   :  { %3547 = vmatprep.subr.bf16.mxu0 %v3546_v7 }
 0x76d   :  { %3549 = vmatpush3.bf16.msra.mxu0 %v3546_v7 }
 0x7e8   :  { %v1074_v41 = vpop.xlane.xlu1 %1073 }
 0x7e9   :  { %v1078_v3 = vmul.f32 0.03125, %v1074_v41  ;;  %v1187_v41 = vsub.s32 5, %v3976_v26 }
 0x7eb   :  { %v1080_v4 = vadd.f32 1e-05, %v1078_v3  ;;  %v1188_v3 = vrot.slane %v3981_v28, %v1187_v41 }
 0x7ec   :  { %v1077_v24 = vpop.xlane.xlu0 %1076 }
 0x7ed   :  { %3771 = vrsqrt.f32 %v1080_v4  ;;  %v1079_v42 = vmul.f32 0.03125, %v1077_v24 }
 0x7ef   :  { %v1081_v5 = vadd.f32 1e-05, %v1079_v42 }
 0x7f1   :  { %3773 = vrsqrt.f32 %v1081_v5 }
 0x7f7   :  { %v3772_v10 = vpop.eup %3771 }
 0x7f8   :  { %v1084_v58 = vmul.f32 %v3772_v10, %v4260_v55  ;;  %v1100_v55 = vsub.s32 4, %v3976_v26 }
 0x7fa   :  { %v1090_v20 = vmul.f32 %v1089_v9, %v1084_v58  ;;  %v1101_v11 = vrot.slane %v3981_v28, %v1100_v55 }
 0x7fb   :  { %v3774_v25 = vpop.eup %3773 }
 0x7fc   :  { %v1085_v29 = vmul.f32 %v3774_v25, %v4264_v40  ;;  %v1096_v30 = vadd.f32 %v1095_v19, %v1090_v20 }
 0x7fe   :  { %v1091_v33 = vmul.f32 %v1089_v9, %v1085_v29  ;;  %3096 = vmatprep.mubr.msk.f32.mxu1 %vm179_vm1, %v1096_v30 }
 0x800   :  { %v1097_v34 = vadd.f32 %v1095_v19, %v1091_v33 }
 0x802   :  { %3097 = vmatmul.mubr.msk.f32.vlgmr.msra.gmra.mrb[20].mxu1 %vm179_vm1, %v1097_v34 }
 0x8d5   :  { %v3098_v16 = vpop.f32.mrb[20].mxu1 }
 0x8d6   :  { %v1180_v40 = vadd.f32 %v3098_v16, %v1101_v11  ;;  %v1174_v39 = vpop.f32.mrb[21].mxu1 }
 0x8d7   :  { %v1175_v22 = vadd.f32 %v1174_v39, %v1101_v11 }
 0x8d8   :  { %v1184_v17 = vmax.f32 %v1180_v40, 0.0  ;;  %v1305_v40 = vld [vmem:[#allocation5 + $0xf0] sm:$0xff] }
 0x8d9   :  { %v1183_v23 = vmax.f32 %v1175_v22, 0.0  ;;  %v1306_v22 = vld [vmem:[#allocation5 + $0xf8] sm:$0xff] }
 0x8db   :  { %3131 = vmatprep.mubr.f32.mxu0 %v1183_v23  ;;  %v1307_v23 = vld [vmem:[#allocation5 + $0x100] sm:$0xff] }
 0x8dc   :  { %3132 = vmatmul.mubr.f32.vlgmr.msra.gmra.mrb[24].mxu0 %v1184_v17  ;;  %v3554_v17 = vpack.c.bf16 %v1307_v23, %v1306_v22 }
 0x8dd   :  { %3177 = vmatprep.mubr.msk.f32.mxu0 %vm46_vm0, %v4041_v59 }
 0x9af   :  { %v3133_v4 = vpop.f32.mrb[24].mxu0 }
 0x9b0   :  { %v1261_v24 = vadd.f32 %v3133_v4, %v1188_v3  ;;  %v1255_v42 = vpop.f32.mrb[25].mxu0 }
 0x9b1   :  { %v1256_v5 = vadd.f32 %v1255_v42, %v1188_v3 }
 0x9b2   :  { %v1265_v9 = vadd.f32 %v1261_v24, %v1097_v34 }
 0x9b3   :  { %v1264_v10 = vadd.f32 %v1256_v5, %v1096_v30  ;;  %v1304_v30 = vld [vmem:[#allocation5 + $0xe8] sm:$0xff] }
 0x9b4   :  { %v1269_v58 = vsel %vm179_vm1, %v1265_v9, 0.0  ;;  %v3550_v39 = vpack.c.bf16 %v1305_v40, %v1304_v30 }
 0x9b5   :  { %1270 = vadd.xlane.f32.xlu0 %v1269_v58  ;;  %v1266_v19 = vsel %vm179_vm1, %v1264_v10, 0.0  ;;  %v1300_v58 = vsub.s32 7, %v3976_v26 }
 0x9b6   :  { %1267 = vadd.xlane.f32.xlu1 %v1266_v19  ;;  %3551 = vmatprep.subr.bf16.mxu1 %v3550_v39 }
 0x9b7   :  { %3553 = vmatpush3.bf16.msra.mxu1 %v3550_v39 }
 0x9b8   :  { %3555 = vmatprep.subr.bf16.mxu1 %v3554_v17 }
 0x9bb   :  { %3557 = vmatpush3.bf16.msra.mxu1 %v3554_v17 }
 0xa42   :  { %v1271_v20 = vpop.xlane.xlu0 %1270 }
 0xa43   :  { %v1273_v25 = vmul.f32 0.03125, %v1271_v20  ;;  %v1268_v29 = vpop.xlane.xlu1 %1267 }
 0xa44   :  { %v1272_v33 = vmul.f32 0.03125, %v1268_v29 }
 0xa45   :  { %v1275_v51 = vsub.f32 %v1265_v9, %v1273_v25 }
 0xa46   :  { %v1274_v52 = vsub.f32 %v1264_v10, %v1272_v33  ;;  %v1294_v10 = vsub.s32 6, %v3976_v26 }
 0xa47   :  { %v1277_v7 = vmul.f32 %v1275_v51, %v1275_v51 }
 0xa48   :  { %v1276_v11 = vmul.f32 %v1274_v52, %v1274_v52  ;;  %v1295_v19 = vrot.slane %v3981_v28, %v1294_v10 }
 0xa49   :  { %v1281_v16 = vsel %vm179_vm1, %v1277_v7, 0.0  ;;  %v1301_v7 = vrot.slane %v3981_v28, %v1300_v58 }
 0xa4a   :  { %1282 = vadd.xlane.f32.xlu0 %v1281_v16  ;;  %v1278_v34 = vsel %vm179_vm1, %v1276_v11, 0.0 }
 0xa4b   :  { %1279 = vadd.xlane.f32.xlu1 %v1278_v34 }
 0xad7   :  { %v1283_v3 = vpop.xlane.xlu0 %1282 }
 0xad8   :  { %v1285_v4 = vmul.f32 0.03125, %v1283_v3  ;;  %v1280_v24 = vpop.xlane.xlu1 %1279 }
 0xad9   :  { %v1284_v42 = vmul.f32 0.03125, %v1280_v24 }
 0xada   :  { %v1287_v5 = vadd.f32 1e-05, %v1285_v4 }
 0xadb   :  { %v1286_v9 = vadd.f32 1e-05, %v1284_v42 }
 0xadc   :  { %3775 = vrsqrt.f32 %v1287_v5 }
 0xadd   :  { %3777 = vrsqrt.f32 %v1286_v9 }
 0xae6   :  { %v3776_v20 = vpop.eup %3775 }
 0xae7   :  { %v3778_v25 = vpop.eup %3777  ;;  %v1291_v29 = vmul.f32 %v3776_v20, %v1275_v51  ;;  %v4314_v51 = vld [vmem:[#allocation5 + $0x1c8] sm:$0xff] }
 0xae8   :  { %v1290_v33 = vmul.f32 %v3778_v25, %v1274_v52  ;;  %v1336_v28 = vrot.slane %v4314_v51, %v3979_v27  ;;  %v3800_v25 = vld [vmem:[#allocation5 + $0x208] sm:$0xff] }
 0xae9   :  { %v1297_v11 = vmul.f32 %v1295_v19, %v1291_v29 }
 0xaea   :  { %v1296_v16 = vmul.f32 %v1295_v19, %v1290_v33 }
 0xaeb   :  { %v4306_v30 = vadd.f32 %v1301_v7, %v1297_v11 }
 0xaec   :  { %v4304_v34 = vadd.f32 %v1301_v7, %v1296_v16 }
 0xaee   :  { %3142 = vmatprep.mubr.msk.f32.mxu1 %vm179_vm1, %v4304_v34 }
 0xaef   :  { %3143 = vmatmul.mubr.msk.f32.vlgmr.msra.gmra.mrb[22].mxu1 %vm179_vm1, %v4306_v30 }
 0xaf0   :  { %3149 = vmatprep.mubr.msk.f32.mxu1 %vm46_vm0, %v4041_v59 }
 0xbc2   :  { %v3144_v52 = vpop.f32.mrb[22].mxu1 }
 0xbc3   :  { %v4318_v40 = vadd.f32 %v3144_v52, %v1336_v28  ;;  %v1409_v39 = vpop.f32.mrb[23].mxu1 }
 0xbc4   :  { %v1410_v22 = vadd.f32 %v1409_v39, %v1336_v28 }
 0xbc6   :  { %v3756_v23 = vpack.i.bf16 %v4318_v40, %v1410_v22 }
 0xbc8   :  { %3757 = vrot.lane.b32.xlu0 %v3756_v23, %s3889_s6  ;;  %3752 = vrot.lane.b32.xlu1 %v3756_v23, %s3888_s1 }
 0xc3a   :  { %v3758_v17 = vpop.permute.xlu0 %3757  ;;  %v3753_v3 = vpop.permute.xlu1 %3752 }
 0xc3b   :  { %v3760_v4 = vunpack.i.h.bf16 %v3758_v17  ;;  %v3759_v59 = vunpack.i.l.bf16 %v3758_v17  ;;  %v3755_v24 = vunpack.i.h.bf16 %v3753_v3  ;;  %v3754_v42 = vunpack.i.l.bf16 %v3753_v3 }
 0xc3d   :  { %v3562_v5 = vpack.c.bf16 %v3760_v4, %v3759_v59  ;;  %v3558_v9 = vpack.c.bf16 %v3755_v24, %v3754_v42 }
 0xc3f   :  { %3559 = vmatprep.subr.bf16.mxu1 %v3558_v9  ;;  %3563 = vmatprep.subr.bf16.mxu0 %v3562_v5 }
 0xc40   :  { %3561 = vmatpush3.bf16.msra.mxu1 %v3558_v9  ;;  %3565 = vmatpush3.bf16.msra.mxu0 %v3562_v5  ;;  %v3802_v5 = vld [vmem:[#allocation5 + $0x230] sm:$0xff] }
 0xc43   :  { %3150 = vmatmul.mubr.msk.f32.vlgmr.msra.gmra.mrb[24].mxu1 %vm46_vm0, %v4025_v43  ;;  %3178 = vmatmul.mubr.msk.f32.vlgmr.msra.gmra.mrb[26].mxu0 %vm46_vm0, %v4025_v43 }
 0xc44   :  { %3152 = vmatprep.mubr.msk.f32.mxu1 %vm46_vm0, %v4027_v44  ;;  %3180 = vmatprep.mubr.msk.f32.mxu0 %vm46_vm0, %v4027_v44 }
 0xc47   :  { %3153 = vmatmul.mubr.msk.f32.gmra.mrb[26].mxu1 %vm46_vm0, %v4047_v60  ;;  %3181 = vmatmul.mubr.msk.f32.gmra.mrb[28].mxu0 %vm46_vm0, %v4047_v60 }
 0xc48   :  { %3155 = vmatprep.mubr.msk.f32.mxu1 %vm46_vm0, %v4029_v45  ;;  %3183 = vmatprep.mubr.msk.f32.mxu0 %vm46_vm0, %v4029_v45  ;;  %v3799_v45 = vld [vmem:[#allocation5 + $0x200] sm:$0xff] }
 0xc4b   :  { %3156 = vmatmul.mubr.msk.f32.gmra.mrb[28].mxu1 %vm46_vm0, %v4057_v61  ;;  %3184 = vmatmul.mubr.msk.f32.gmra.mrb[30].mxu0 %vm46_vm0, %v4057_v61 }
 0xc4c   :  { %3158 = vmatprep.mubr.msk.f32.mxu1 %vm46_vm0, %v4031_v46  ;;  %3186 = vmatprep.mubr.msk.f32.mxu0 %vm46_vm0, %v4031_v46 }
 0xc4f   :  { %3159 = vmatmul.mubr.msk.f32.gmra.mrb[30].mxu1 %vm46_vm0, %v4067_v62  ;;  %3187 = vmatmul.mubr.msk.f32.gmra.mrb[32].mxu0 %vm46_vm0, %v4067_v62 }
 0xc50   :  { %3161 = vmatprep.mubr.msk.f32.mxu1 %vm46_vm0, %v4033_v47  ;;  %3189 = vmatprep.mubr.msk.f32.mxu0 %vm46_vm0, %v4033_v47 }
 0xc53   :  { %3162 = vmatmul.mubr.msk.f32.gmra.mrb[32].mxu1 %vm46_vm0, %v4077_v63  ;;  %3190 = vmatmul.mubr.msk.f32.gmra.mrb[34].mxu0 %vm46_vm0, %v4077_v63 }
 0xc54   :  { %3164 = vmatprep.mubr.msk.f32.mxu1 %vm46_vm0, %v4035_v48  ;;  %3192 = vmatprep.mubr.msk.f32.mxu0 %vm46_vm0, %v4035_v48 }
 0xc57   :  { %3165 = vmatmul.mubr.msk.f32.gmra.mrb[34].mxu1 %vm46_vm0, %v4087_v0  ;;  %3193 = vmatmul.mubr.msk.f32.gmra.mrb[36].mxu0 %vm46_vm0, %v4087_v0 }
 0xc58   :  { %3167 = vmatprep.mubr.msk.f32.mxu1 %vm46_vm0, %v4037_v49  ;;  %3195 = vmatprep.mubr.msk.f32.mxu0 %vm46_vm0, %v4037_v49 }
 0xc5b   :  { %3168 = vmatmul.mubr.msk.f32.gmra.mrb[36].mxu1 %vm46_vm0, %v4097_v1  ;;  %3196 = vmatmul.mubr.msk.f32.gmra.mrb[38].mxu0 %vm46_vm0, %v4097_v1 }
 0xc5c   :  { %3170 = vmatprep.mubr.msk.f32.mxu1 %vm46_vm0, %v4039_v50  ;;  %3198 = vmatprep.mubr.msk.f32.mxu0 %vm46_vm0, %v4039_v50 }
 0xc5f   :  { %3171 = vmatmul.mubr.msk.f32.gmra.mrb[38].mxu1 %vm46_vm0, %v4111_v2  ;;  %3199 = vmatmul.mubr.msk.f32.gmra.mrb[40].mxu0 %vm46_vm0, %v4111_v2 }
 0xc60   :  { %3233 = vmatprep.mubr.msk.f32.mxu1 %vm179_vm1, %v1410_v22  ;;  %v3801_v22 = vld [vmem:[#allocation5 + $0x218] sm:$0xff] }
 0xd16   :  { %v3151_v43 = vpop.f32.mrb[24].mxu1  ;;  %v3179_v44 = vpop.f32.mrb[26].mxu0 }
 0xd17   :  { %v1572_v46 = vmul.f32 %v3799_v45, %v3151_v43  ;;  %v1739_v47 = vmul.f32 %v3799_v45, %v3179_v44  ;;  %v1492_v48 = vpop.f32.mrb[25].mxu1  ;;  %v1659_v49 = vpop.f32.mrb[27].mxu0  ;;  %v3803_v44 = vld [vmem:[#allocation5 + $0x228] sm:$0xff] }
 0xd18   :  { %v1571_v60 = vmul.f32 %v1492_v48, %v3993_v35  ;;  %v1738_v61 = vmul.f32 %v1659_v49, %v3993_v35 }
 0xd1a   :  { %v3566_v50 = vpack.c.bf16 %v1572_v46, %v1571_v60  ;;  %v3614_v62 = vpack.c.bf16 %v1739_v47, %v1738_v61  ;;  %v3154_v63 = vpop.f32.mrb[26].mxu1  ;;  %v3182_v0 = vpop.f32.mrb[28].mxu0 }
 0xd1b   :  { %v1574_v1 = vmul.f32 %v3154_v63, %v3997_v36  ;;  %v1741_v2 = vmul.f32 %v3182_v0, %v3997_v36  ;;  %v1502_v19 = vpop.f32.mrb[27].mxu1  ;;  %v1669_v20 = vpop.f32.mrb[29].mxu0  ;;  %v3805_v0 = vld [vmem:[#allocation5 + $0x238] sm:$0xff] }
 0xd1c   :  { %v1573_v29 = vmul.f32 %v3800_v25, %v1502_v19  ;;  %v1740_v33 = vmul.f32 %v3800_v25, %v1669_v20  ;;  %3568 = vmatprep.subr.msk.bf16.mxu1 %vm4129_vm2, %v3566_v50  ;;  %3615 = vmatprep.subr.bf16.mxu0 %v3614_v62 }
 0xd1d   :  { %3571 = vmatpush3.bf16.xpose.msk.msra.mxu1 %vm4129_vm2, %v3566_v50  ;;  %3617 = vmatpush3.bf16.msra.mxu0 %v3614_v62 }
 0xd1e   :  { %v3572_v35 = vpack.c.bf16 %v1574_v1, %v1573_v29  ;;  %v3618_v7 = vpack.c.bf16 %v1741_v2, %v1740_v33  ;;  %v3157_v11 = vpop.f32.mrb[28].mxu1  ;;  %v3185_v16 = vpop.f32.mrb[30].mxu0  ;;  %v3806_v33 = vld [vmem:[#allocation5 + $0x250] sm:$0xff] }
 0xd1f   :  { %v1576_v28 = vmul.f32 %v3157_v11, %v4001_v37  ;;  %v1743_v36 = vmul.f32 %v3185_v16, %v4001_v37  ;;  %v1512_v52 = vpop.f32.mrb[29].mxu1  ;;  %v1679_v39 = vpop.f32.mrb[31].mxu0 }
 0xd20   :  { %v1575_v23 = vmul.f32 %v3801_v22, %v1512_v52  ;;  %v1742_v17 = vmul.f32 %v3801_v22, %v1679_v39  ;;  %3574 = vmatprep.subr.msk.bf16.mxu1 %vm4129_vm2, %v3572_v35  ;;  %3619 = vmatprep.subr.bf16.mxu0 %v3618_v7 }
 0xd21   :  { %3621 = vmatpush3.bf16.msra.mxu0 %v3618_v7 }
 0xd22   :  { %v3578_v3 = vpack.c.bf16 %v1576_v28, %v1575_v23  ;;  %v3622_v4 = vpack.c.bf16 %v1743_v36, %v1742_v17  ;;  %v3160_v59 = vpop.f32.mrb[30].mxu1  ;;  %v3188_v24 = vpop.f32.mrb[32].mxu0  ;;  %v3807_v28 = vld [vmem:[#allocation5 + $0x248] sm:$0xff] }
 0xd23   :  { %v1578_v42 = vmul.f32 %v3160_v59, %v4005_v38  ;;  %v1745_v9 = vmul.f32 %v3802_v5, %v3188_v24  ;;  %v1522_v43 = vpop.f32.mrb[31].mxu1  ;;  %v1689_v37 = vpop.f32.mrb[33].mxu0  ;;  %v3804_v38 = vld [vmem:[#allocation5 + $0x240] sm:$0xff] }
 0xd24   :  { %v1577_v45 = vmul.f32 %v3803_v44, %v1522_v43  ;;  %v1744_v46 = vmul.f32 %v3803_v44, %v1689_v37  ;;  %3623 = vmatprep.subr.bf16.mxu0 %v3622_v4 }
 0xd25   :  { %3577 = vmatpush3.bf16.xpose.msk.msra.mxu1 %vm4129_vm2, %v3572_v35  ;;  %3625 = vmatpush3.bf16.msra.mxu0 %v3622_v4  ;;  %v3808_v4 = vld [vmem:[#allocation5 + $0x260] sm:$0xff] }
 0xd26   :  { %v3584_v47 = vpack.c.bf16 %v1578_v42, %v1577_v45  ;;  %v3626_v48 = vpack.c.bf16 %v1745_v9, %v1744_v46  ;;  %v3163_v49 = vpop.f32.mrb[32].mxu1  ;;  %v3191_v60 = vpop.f32.mrb[34].mxu0  ;;  %3580 = vmatprep.subr.msk.bf16.mxu1 %vm4129_vm2, %v3578_v3  ;;  %v3809_v9 = vld [vmem:[#allocation5 + $0x258] sm:$0xff] }
 0xd27   :  { %v1580_v61 = vmul.f32 %v3804_v38, %v3163_v49  ;;  %v1747_v50 = vmul.f32 %v3804_v38, %v3191_v60  ;;  %v1532_v62 = vpop.f32.mrb[33].mxu1  ;;  %v1699_v63 = vpop.f32.mrb[35].mxu0 }
 0xd28   :  { %v1579_v1 = vmul.f32 %v3805_v0, %v1532_v62  ;;  %v1746_v2 = vmul.f32 %v3805_v0, %v1699_v63  ;;  %3627 = vmatprep.subr.bf16.mxu0 %v3626_v48 }
 0xd29   :  { %3629 = vmatpush3.bf16.msra.mxu0 %v3626_v48  ;;  %v3810_v48 = vld [vmem:[#allocation5 + $0x270] sm:$0xff] }
 0xd2a   :  { %v3590_v19 = vpack.c.bf16 %v1580_v61, %v1579_v1  ;;  %v3630_v20 = vpack.c.bf16 %v1747_v50, %v1746_v2  ;;  %v3166_v25 = vpop.f32.mrb[34].mxu1  ;;  %v3194_v29 = vpop.f32.mrb[36].mxu0  ;;  %v3811_v50 = vld [vmem:[#allocation5 + $0x268] sm:$0xff] }
 0xd2b   :  { %v1582_v35 = vmul.f32 %v3806_v33, %v3166_v25  ;;  %v1749_v7 = vmul.f32 %v3806_v33, %v3194_v29  ;;  %v1542_v11 = vpop.f32.mrb[35].mxu1  ;;  %v1709_v16 = vpop.f32.mrb[37].mxu0 }
 0xd2c   :  { %v1581_v36 = vmul.f32 %v3807_v28, %v1542_v11  ;;  %v1748_v52 = vmul.f32 %v3807_v28, %v1709_v16  ;;  %3631 = vmatprep.subr.bf16.mxu0 %v3630_v20 }
 0xd2d   :  { %3583 = vmatpush3.bf16.xpose.msk.msra.mxu1 %vm4129_vm2, %v3578_v3  ;;  %3633 = vmatpush3.bf16.msra.mxu0 %v3630_v20 }
 0xd2e   :  { %v3596_v39 = vpack.c.bf16 %v1582_v35, %v1581_v36  ;;  %v3634_v22 = vpack.c.bf16 %v1749_v7, %v1748_v52  ;;  %v3169_v23 = vpop.f32.mrb[36].mxu1  ;;  %v3197_v17 = vpop.f32.mrb[38].mxu0  ;;  %3586 = vmatprep.subr.msk.bf16.mxu1 %vm4129_vm2, %v3584_v47 }
 0xd2f   :  { %v1584_v59 = vmul.f32 %v3808_v4, %v3169_v23  ;;  %v1751_v24 = vmul.f32 %v3808_v4, %v3197_v17  ;;  %v1552_v42 = vpop.f32.mrb[37].mxu1  ;;  %v1719_v5 = vpop.f32.mrb[39].mxu0  ;;  %v2052_v17 = vrot.slane %v4314_v51, %v4252_v32 }
 0xd30   :  { %v1583_v43 = vmul.f32 %v3809_v9, %v1552_v42  ;;  %v1750_v37 = vmul.f32 %v3809_v9, %v1719_v5  ;;  %3635 = vmatprep.subr.bf16.mxu0 %v3634_v22 }
 0xd31   :  { %3637 = vmatpush3.bf16.msra.mxu0 %v3634_v22 }
 0xd32   :  { %v3602_v44 = vpack.c.bf16 %v1584_v59, %v1583_v43  ;;  %v3638_v3 = vpack.c.bf16 %v1751_v24, %v1750_v37  ;;  %v3172_v45 = vpop.f32.mrb[38].mxu1  ;;  %v3200_v46 = vpop.f32.mrb[40].mxu0 }
 0xd33   :  { %v1586_v49 = vmul.f32 %v3810_v48, %v3172_v45  ;;  %v1753_v60 = vmul.f32 %v3810_v48, %v3200_v46  ;;  %v1562_v38 = vpop.f32.mrb[39].mxu1  ;;  %v1729_v61 = vpop.f32.mrb[41].mxu0 }
 0xd34   :  { %v1585_v62 = vmul.f32 %v3811_v50, %v1562_v38  ;;  %v1752_v63 = vmul.f32 %v3811_v50, %v1729_v61  ;;  %3639 = vmatprep.subr.bf16.mxu0 %v3638_v3  ;;  %v1313_v50 = vld [vmem:[#allocation5 + $0x130] sm:$0xff] }
 0xd35   :  { %3589 = vmatpush3.bf16.xpose.msk.msra.mxu1 %vm4129_vm2, %v3584_v47  ;;  %3641 = vmatpush3.bf16.msra.mxu0 %v3638_v3 }
 0xd36   :  { %v3608_v0 = vpack.c.bf16 %v1586_v49, %v1585_v62  ;;  %v3642_v1 = vpack.c.bf16 %v1753_v60, %v1752_v63  ;;  %3592 = vmatprep.subr.msk.bf16.mxu1 %vm4129_vm2, %v3590_v19  ;;  %v1314_v63 = vld [vmem:[#allocation5 + $0x138] sm:$0xff] }
 0xd38   :  { %3643 = vmatprep.subr.bf16.mxu0 %v3642_v1 }
 0xd39   :  { %3645 = vmatpush3.bf16.msra.mxu0 %v3642_v1 }
 0xd3a   :  { %3647 = vmatprep.subr.bf16.mxu0 %v4197_v21 }
 0xd3d   :  { %3595 = vmatpush3.bf16.xpose.msk.msra.mxu1 %vm4129_vm2, %v3590_v19 }
 0xd3e   :  { %3598 = vmatprep.subr.msk.bf16.mxu1 %vm4129_vm2, %v3596_v39 }
 0xd45   :  { %3601 = vmatpush3.bf16.xpose.msk.msra.mxu1 %vm4129_vm2, %v3596_v39 }
 0xd46   :  { %3604 = vmatprep.subr.msk.bf16.mxu1 %vm4129_vm2, %v3602_v44 }
 0xd4d   :  { %3607 = vmatpush3.bf16.xpose.msk.msra.mxu1 %vm4129_vm2, %v3602_v44 }
 0xd4e   :  { %3610 = vmatprep.subr.msk.bf16.mxu1 %vm4129_vm2, %v3608_v0 }
 0xd55   :  { %3613 = vmatpush3.bf16.xpose.msk.msra.mxu1 %vm4129_vm2, %v3608_v0  ;;  %v1315_v0 = vld [vmem:[#allocation5 + $0x140] sm:$0xff] }
 0xd56   :  { %v3690_v1 = vpack.c.bf16 %v1315_v0, %v1314_v63 }
 0xd5c   :  { %3234 = vmatmul.mubr.msk.f32.vlgmr.msra.gmra.mrb[40].mxu1 %vm179_vm1, %v4318_v40 }
 0xe2f   :  { %v3235_v47 = vpop.f32.mrb[40].mxu1 }
 0xe30   :  { %v1882_v2 = vmul.f32 0.5, %v3235_v47  ;;  %v1872_v19 = vpop.f32.mrb[41].mxu1  ;;  %v1316_v47 = vld [vmem:[#allocation5 + $0x148] sm:$0xff] }
 0xe31   :  { %v1881_v20 = vmul.f32 0.5, %v1872_v19 }
 0xe32   :  { %1885 = vmax.xlane.f32.xlu0 %v1882_v2 }
 0xe33   :  { %1883 = vmax.xlane.f32.xlu1 %v1881_v20 }
 0xebf   :  { %v1886_v25 = vpop.xlane.xlu0 %1885 }
 0xec0   :  { %v1888_v29 = vsub.f32 %v1882_v2, %v1886_v25  ;;  %v1884_v33 = vpop.xlane.xlu1 %1883  ;;  %v1317_v2 = vld [vmem:[#allocation5 + $0x150] sm:$0xff] }
 0xec1   :  { %v1887_v35 = vsub.f32 %v1881_v20, %v1884_v33  ;;  %v3694_v19 = vpack.c.bf16 %v1317_v2, %v1316_v47 }
 0xec2   :  { %v1891_v7 = vmul.f32 1.442695, %v1888_v29 }
 0xec3   :  { %v1889_v11 = vmul.f32 1.442695, %v1887_v35 }
 0xec4   :  { %3779 = vpow2.f32 %v1891_v7 }
 0xec5   :  { %3781 = vpow2.f32 %v1889_v11  ;;  %v2165_v11 = vrot.slane %v4314_v51, %v1088_v6 }
 0xece   :  { %v3780_v16 = vpop.eup %3779 }
 0xecf   :  { %v3782_v28 = vpop.eup %3781  ;;  %v1894_v40 = vmul.f32 %v3780_v16, %v4202_v54 }
 0xed0   :  { %v1893_v36 = vmul.f32 %v3782_v28, %v4200_v31  ;;  %v1309_v31 = vld [vmem:[#allocation5 + $0x110] sm:$0xff] }
 0xed2   :  { %3268 = vmatprep.mubr.f32.mxu0 %v1893_v36 }
 0xed3   :  { %3269 = vmatmul.mubr.f32.vlgmr.msra.gmra.mrb[42].mxu0 %v1894_v40 }
 0xed4   :  { %3649 = vmatpush3.bf16.msra.mxu0 %v4197_v21  ;;  %3303 = vmatprep.mubr.f32.mxu0 %v1893_v36  ;;  %v1308_v21 = vld [vmem:[#allocation5 + $0x108] sm:$0xff] }
 0xed5   :  { %3651 = vmatprep.subr.bf16.mxu0 %v4208_v56  ;;  %v3678_v54 = vpack.c.bf16 %v1309_v31, %v1308_v21  ;;  %v2171_v21 = vrot.slane %v4314_v51, %v1094_v8 }
 0xed7   :  { %3679 = vmatprep.subr.bf16.mxu1 %v3678_v54 }
 0xed8   :  { %3653 = vmatpush3.bf16.msra.mxu0 %v4208_v56  ;;  %3681 = vmatpush3.bf16.msra.mxu1 %v3678_v54  ;;  %v1310_v56 = vld [vmem:[#allocation5 + $0x118] sm:$0xff] }
 0xed9   :  { %3655 = vmatprep.subr.bf16.mxu0 %v4214_v57 }
 0xedc   :  { %3657 = vmatpush3.bf16.msra.mxu0 %v4214_v57  ;;  %v1311_v57 = vld [vmem:[#allocation5 + $0x120] sm:$0xff] }
 0xedd   :  { %3659 = vmatprep.subr.bf16.mxu0 %v4220_v53 }
 0xee0   :  { %3661 = vmatpush3.bf16.msra.mxu0 %v4220_v53  ;;  %v3682_v53 = vpack.c.bf16 %v1311_v57, %v1310_v56  ;;  %v1318_v56 = vld [vmem:[#allocation5 + $0x158] sm:$0xff]  ;;  %v1319_v57 = vld [vmem:[#allocation5 + $0x160] sm:$0xff] }
 0xee1   :  { %3663 = vmatprep.subr.bf16.mxu0 %v4226_v12 }
 0xee2   :  { %3683 = vmatprep.subr.bf16.mxu1 %v3682_v53 }
 0xee3   :  { %3685 = vmatpush3.bf16.msra.mxu1 %v3682_v53 }
 0xee4   :  { %3665 = vmatpush3.bf16.msra.mxu0 %v4226_v12 }
 0xee5   :  { %3667 = vmatprep.subr.bf16.mxu0 %v4232_v13 }
 0xee8   :  { %3669 = vmatpush3.bf16.msra.mxu0 %v4232_v13 }
 0xee9   :  { %3671 = vmatprep.subr.bf16.mxu0 %v4238_v14 }
 0xeec   :  { %3673 = vmatpush3.bf16.msra.mxu0 %v4238_v14 }
 0xeed   :  { %3675 = vmatprep.subr.bf16.mxu0 %v4244_v15 }
 0xef0   :  { %3677 = vmatpush3.bf16.msra.mxu0 %v4244_v15 }
 0xef3   :  { %3304 = vmatmul.mubr.f32.vlgmr.msra.gmra.mrb[44].mxu0 %v1894_v40 }
 0xfa6   :  { %v3270_v12 = vpop.f32.mrb[42].mxu0 }
 0xfa7   :  { %v1961_v13 = vpop.f32.mrb[43].mxu0 }
 0xfc6   :  { %v3305_v52 = vpop.f32.mrb[44].mxu0 }
 0xfc7   :  { %3783 = vrcp.f32 %v3305_v52  ;;  %v2036_v14 = vpop.f32.mrb[45].mxu0  ;;  %v1320_v52 = vld [vmem:[#allocation5 + $0x168] sm:$0xff] }
 0xfc8   :  { %3785 = vrcp.f32 %v2036_v14  ;;  %v1321_v14 = vld [vmem:[#allocation5 + $0x170] sm:$0xff] }
 0xfc9   :  { %v3702_v6 = vpack.c.bf16 %v1321_v14, %v1320_v52 }
 0xfd1   :  { %v3784_v39 = vpop.eup %3783 }
 0xfd2   :  { %v3786_v22 = vpop.eup %3785  ;;  %v2048_v15 = vmul.f32 %v3784_v39, %v3270_v12  ;;  %v1322_v39 = vld [vmem:[#allocation5 + $0x178] sm:$0xff] }
 0xfd3   :  { %v2047_v23 = vmul.f32 %v3786_v22, %v1961_v13  ;;  %v3698_v13 = vpack.c.bf16 %v1319_v57, %v1318_v56  ;;  %v1323_v22 = vld [vmem:[#allocation5 + $0x180] sm:$0xff] }
 0xfd4   :  { %v3706_v8 = vpack.c.bf16 %v1323_v22, %v1322_v39 }
 0xfd5   :  { %3314 = vmatprep.mubr.msk.f32.mxu1 %vm179_vm1, %v2047_v23  ;;  %v1325_v23 = vld [vmem:[#allocation5 + $0x190] sm:$0xff] }
 0xfd6   :  { %3315 = vmatmul.mubr.msk.f32.vlgmr.msra.gmra.mrb[42].mxu1 %vm179_vm1, %v2048_v15  ;;  %v1324_v15 = vld [vmem:[#allocation5 + $0x188] sm:$0xff] }
0x10a9   :  { %v3316_v4 = vpop.f32.mrb[42].mxu1 }
0x10aa   :  { %v2131_v59 = vadd.f32 %v3316_v4, %v2052_v17  ;;  %v2125_v24 = vpop.f32.mrb[43].mxu1  ;;  %v1326_v4 = vld [vmem:[#allocation5 + $0x198] sm:$0xff] }
0x10ab   :  { %v2126_v42 = vadd.f32 %v2125_v24, %v2052_v17  ;;  %v3710_v17 = vpack.c.bf16 %v1325_v23, %v1324_v15 }
0x10ac   :  { %v2135_v5 = vadd.f32 %v2131_v59, %v4306_v30  ;;  %v1327_v59 = vld [vmem:[#allocation5 + $0x1a0] sm:$0xff] }
0x10ad   :  { %v2134_v9 = vadd.f32 %v2126_v42, %v4304_v34  ;;  %v1312_v34 = vld [vmem:[#allocation5 + $0x128] sm:$0xff]  ;;  %v3714_v24 = vpack.c.bf16 %v1327_v59, %v1326_v4 }
0x10ae   :  { %v2139_v43 = vsel %vm179_vm1, %v2135_v5, 0.0  ;;  %v3686_v62 = vpack.c.bf16 %v1313_v50, %v1312_v34  ;;  %v1328_v42 = vld [vmem:[#allocation5 + $0x1a8] sm:$0xff] }
0x10af   :  { %2140 = vadd.xlane.f32.xlu0 %v2139_v43  ;;  %v2136_v37 = vsel %vm179_vm1, %v2134_v9, 0.0  ;;  %v1330_v43 = vld [vmem:[#allocation5 + $0x1b8] sm:$0xff] }
0x10b0   :  { %2137 = vadd.xlane.f32.xlu1 %v2136_v37  ;;  %3687 = vmatprep.subr.bf16.mxu1 %v3686_v62  ;;  %v1331_v37 = vld [vmem:[#allocation5 + $0x1c0] sm:$0xff] }
0x10b1   :  { %3689 = vmatpush3.bf16.msra.mxu1 %v3686_v62 }
0x10b2   :  { %3691 = vmatprep.subr.bf16.mxu1 %v3690_v1 }
0x10b5   :  { %3693 = vmatpush3.bf16.msra.mxu1 %v3690_v1 }
0x10b6   :  { %3695 = vmatprep.subr.bf16.mxu1 %v3694_v19 }
0x113c   :  { %v2141_v44 = vpop.xlane.xlu0 %2140 }
0x113d   :  { %v2143_v3 = vmul.f32 0.03125, %v2141_v44  ;;  %v2138_v45 = vpop.xlane.xlu1 %2137  ;;  %v3722_v44 = vpack.c.bf16 %v1331_v37, %v1330_v43 }
0x113e   :  { %v2142_v46 = vmul.f32 0.03125, %v2138_v45 }
0x113f   :  { %v2145_v48 = vsub.f32 %v2135_v5, %v2143_v3  ;;  %v1329_v5 = vld [vmem:[#allocation5 + $0x1b0] sm:$0xff]  ;;  %v2177_v3 = vrot.slane %v4314_v51, %v1100_v55 }
0x1140   :  { %v2144_v49 = vsub.f32 %v2134_v9, %v2142_v46  ;;  %v3718_v9 = vpack.c.bf16 %v1329_v5, %v1328_v42  ;;  %v3892_v42 = vmov 0.0   ;;  %v2380_v5 = vld [vmem:[#allocation5 + $0x1f0] sm:$0xff] }
0x1141   :  { %v2147_v60 = vmul.f32 %v2145_v48, %v2145_v48  ;;  %3367 = vmatprep.mubr.msk.f32.mxu0 %vm3891_vm3, %v3892_v42 }
0x1142   :  { %v2146_v38 = vmul.f32 %v2144_v49, %v2144_v49 }
0x1143   :  { %v2151_v61 = vsel %vm179_vm1, %v2147_v60, 0.0 }
0x1144   :  { %2152 = vadd.xlane.f32.xlu0 %v2151_v61  ;;  %v2148_v30 = vsel %vm179_vm1, %v2146_v38, 0.0  ;;  %v2264_v61 = vrot.slane %v4314_v51, %v1187_v41 }
0x1145   :  { %2149 = vadd.xlane.f32.xlu1 %v2148_v30 }
0x11d1   :  { %v2153_v20 = vpop.xlane.xlu0 %2152 }
0x11d2   :  { %v2155_v25 = vmul.f32 0.03125, %v2153_v20  ;;  %v2150_v29 = vpop.xlane.xlu1 %2149 }
0x11d3   :  { %v2154_v33 = vmul.f32 0.03125, %v2150_v29 }
0x11d4   :  { %v2157_v35 = vadd.f32 1e-05, %v2155_v25 }
0x11d5   :  { %v2156_v7 = vadd.f32 1e-05, %v2154_v33 }
0x11d6   :  { %3787 = vrsqrt.f32 %v2157_v35 }
0x11d7   :  { %3789 = vrsqrt.f32 %v2156_v7 }
0x11e0   :  { %v3788_v16 = vpop.eup %3787 }
0x11e1   :  { %v3790_v28 = vpop.eup %3789  ;;  %v2161_v36 = vmul.f32 %v3788_v16, %v2145_v48 }
0x11e2   :  { %v2160_v40 = vmul.f32 %v3790_v28, %v2144_v49 }
0x11e3   :  { %v2167_v31 = vmul.f32 %v2165_v11, %v2161_v36 }
0x11e4   :  { %v2166_v54 = vmul.f32 %v2165_v11, %v2160_v40 }
0x11e5   :  { %v2173_v12 = vadd.f32 %v2171_v21, %v2167_v31  ;;  %v2371_v31 = vrot.slane %v4314_v51, %v1294_v10 }
0x11e6   :  { %v2172_v53 = vadd.f32 %v2171_v21, %v2166_v54 }
0x11e8   :  { %3325 = vmatprep.mubr.msk.f32.mxu1 %vm179_vm1, %v2172_v53 }
0x11e9   :  { %3326 = vmatmul.mubr.msk.f32.vlgmr.msra.gmra.mrb[44].mxu1 %vm179_vm1, %v2173_v12 }
0x11ea   :  { %3697 = vmatpush3.bf16.msra.mxu1 %v3694_v19 }
0x11eb   :  { %3699 = vmatprep.subr.bf16.mxu1 %v3698_v13 }
0x11ee   :  { %3701 = vmatpush3.bf16.msra.mxu1 %v3698_v13 }
0x11ef   :  { %3703 = vmatprep.subr.bf16.mxu1 %v3702_v6 }
0x11f2   :  { %3705 = vmatpush3.bf16.msra.mxu1 %v3702_v6 }
0x11f3   :  { %3707 = vmatprep.subr.bf16.mxu1 %v3706_v8 }
0x11f6   :  { %3709 = vmatpush3.bf16.msra.mxu1 %v3706_v8 }
0x11f7   :  { %3711 = vmatprep.subr.bf16.mxu1 %v3710_v17 }
0x11fa   :  { %3713 = vmatpush3.bf16.msra.mxu1 %v3710_v17 }
0x11fb   :  { %3715 = vmatprep.subr.bf16.mxu1 %v3714_v24 }
0x11fe   :  { %3717 = vmatpush3.bf16.msra.mxu1 %v3714_v24  ;;  %v3890_v24 = vmov 0.0|0.0  }
0x11ff   :  { %3719 = vmatprep.subr.bf16.mxu1 %v3718_v9  ;;  %3726 = vmatprep.subr.bf16.mxu0 %v3890_v24 }
0x1202   :  { %3721 = vmatpush3.bf16.msra.mxu1 %v3718_v9  ;;  %v3893_v9 = vmov 0  }
0x1203   :  { %3723 = vmatprep.subr.bf16.mxu1 %v3722_v44  ;;  %3761 = vset.pattern.permute.xlu1 %v3893_v9 }
0x1204   :  { %3762 = vset.pattern.permute.xlu0 %v3893_v9 }
0x1206   :  { %3725 = vmatpush3.bf16.msra.mxu1 %v3722_v44 }
0x12bc   :  { %v3327_v45 = vpop.f32.mrb[44].mxu1 }
0x12bd   :  { %v2256_v46 = vadd.f32 %v3327_v45, %v2177_v3  ;;  %v2250_v48 = vpop.f32.mrb[45].mxu1 }
0x12be   :  { %v2251_v49 = vadd.f32 %v2250_v48, %v2177_v3  ;;  %v2410_v48 = vrot.slane %v2380_v5, %v3979_v27 }
0x12bf   :  { %v2260_v38 = vmax.f32 %v2256_v46, 0.0 }
0x12c0   :  { %v2259_v60 = vmax.f32 %v2251_v49, 0.0 }
0x12c2   :  { %3360 = vmatprep.mubr.f32.mxu1 %v2259_v60 }
0x12c3   :  { %3361 = vmatmul.mubr.f32.vlgmr.msra.gmra.mrb[46].mxu1 %v2260_v38  ;;  %v2416_v38 = vrot.slane %v2380_v5, %v4252_v32 }
0x1396   :  { %v3362_v30 = vpop.f32.mrb[46].mxu1 }
0x1397   :  { %v2337_v34 = vadd.f32 %v3362_v30, %v2264_v61  ;;  %v2331_v50 = vpop.f32.mrb[47].mxu1 }
0x1398   :  { %v2332_v62 = vadd.f32 %v2331_v50, %v2264_v61 }
0x1399   :  { %v2341_v63 = vadd.f32 %v2337_v34, %v2173_v12 }
0x139a   :  { %v2340_v0 = vadd.f32 %v2332_v62, %v2172_v53  ;;  %v2377_v53 = vrot.slane %v4314_v51, %v1300_v58 }
0x139b   :  { %v2345_v55 = vsel %vm179_vm1, %v2341_v63, 0.0 }
0x139c   :  { %2346 = vadd.xlane.f32.xlu0 %v2345_v55  ;;  %v2342_v1 = vsel %vm179_vm1, %v2340_v0, 0.0  ;;  %v2423_v55 = vrot.slane %v2380_v5, 2 }
0x139d   :  { %2343 = vadd.xlane.f32.xlu1 %v2342_v1 }
0x1429   :  { %v2347_v47 = vpop.xlane.xlu0 %2346 }
0x142a   :  { %v2349_v2 = vmul.f32 0.03125, %v2347_v47  ;;  %v2344_v19 = vpop.xlane.xlu1 %2343 }
0x142b   :  { %v2348_v20 = vmul.f32 0.03125, %v2344_v19 }
0x142c   :  { %v2351_v25 = vsub.f32 %v2341_v63, %v2349_v2 }
0x142d   :  { %v2350_v29 = vsub.f32 %v2340_v0, %v2348_v20 }
0x142e   :  { %v2353_v33 = vmul.f32 %v2351_v25, %v2351_v25 }
0x142f   :  { %v2352_v41 = vmul.f32 %v2350_v29, %v2350_v29 }
0x1430   :  { %v2357_v35 = vsel %vm179_vm1, %v2353_v33, 0.0 }
0x1431   :  { %2358 = vadd.xlane.f32.xlu0 %v2357_v35  ;;  %v2354_v7 = vsel %vm179_vm1, %v2352_v41, 0.0 }
0x1432   :  { %2355 = vadd.xlane.f32.xlu1 %v2354_v7 }
0x14be   :  { %v2359_v11 = vpop.xlane.xlu0 %2358 }
0x14bf   :  { %v2361_v16 = vmul.f32 0.03125, %v2359_v11  ;;  %v2356_v28 = vpop.xlane.xlu1 %2355 }
0x14c0   :  { %v2360_v36 = vmul.f32 0.03125, %v2356_v28 }
0x14c1   :  { %v2363_v40 = vadd.f32 1e-05, %v2361_v16 }
0x14c2   :  { %v2362_v21 = vadd.f32 1e-05, %v2360_v36 }
0x14c3   :  { %3791 = vrsqrt.f32 %v2363_v40 }
0x14c4   :  { %3793 = vrsqrt.f32 %v2362_v21 }
0x14cd   :  { %v3792_v54 = vpop.eup %3791 }
0x14ce   :  { %v3794_v56 = vpop.eup %3793  ;;  %v2367_v57 = vmul.f32 %v3792_v54, %v2351_v25 }
0x14cf   :  { %v2366_v12 = vmul.f32 %v3794_v56, %v2350_v29 }
0x14d0   :  { %v2373_v13 = vmul.f32 %v2371_v31, %v2367_v57 }
0x14d1   :  { %v2372_v52 = vmul.f32 %v2371_v31, %v2366_v12 }
0x14d2   :  { %v2379_v14 = vadd.f32 %v2377_v53, %v2373_v13 }
0x14d3   :  { %v2378_v6 = vadd.f32 %v2377_v53, %v2372_v52 }
0x14d4   :  { %v2384_v39 = vsel %vm179_vm1, %v2379_v14, 0.0 }
0x14d5   :  { %2385 = vadd.xlane.f32.xlu0 %v2384_v39  ;;  %v2381_v22 = vsel %vm179_vm1, %v2378_v6, 0.0 }
0x14d6   :  { %2382 = vadd.xlane.f32.xlu1 %v2381_v22 }
0x1562   :  { %v2386_v8 = vpop.xlane.xlu0 %2385 }
0x1563   :  { %v2388_v10 = vmul.f32 0.03125, %v2386_v8  ;;  %v2383_v15 = vpop.xlane.xlu1 %2382 }
0x1564   :  { %v2387_v23 = vmul.f32 0.03125, %v2383_v15 }
0x1565   :  { %v2390_v17 = vsub.f32 %v2379_v14, %v2388_v10 }
0x1566   :  { %v2389_v4 = vsub.f32 %v2378_v6, %v2387_v23 }
0x1567   :  { %v2392_v26 = vmul.f32 %v2390_v17, %v2390_v17 }
0x1568   :  { %v2391_v59 = vmul.f32 %v2389_v4, %v2389_v4 }
0x1569   :  { %v2396_v58 = vsel %vm179_vm1, %v2392_v26, 0.0 }
0x156a   :  { %2397 = vadd.xlane.f32.xlu0 %v2396_v58  ;;  %v2393_v51 = vsel %vm179_vm1, %v2391_v59, 0.0 }
0x156b   :  { %2394 = vadd.xlane.f32.xlu1 %v2393_v51 }
0x157c   :  { %2421 = vperm.xlu1 %3761, %v2380_v5  }
0x15f7   :  { %v2398_v43 = vpop.xlane.xlu0 %2397 }
0x15f8   :  { %v2400_v37 = vmul.f32 0.03125, %v2398_v43  ;;  %v2395_v44 = vpop.xlane.xlu1 %2394 }
0x15f9   :  { %v2399_v3 = vmul.f32 0.03125, %v2395_v44 }
0x15fa   :  { %v2402_v45 = vadd.f32 1e-05, %v2400_v37 }
0x15fb   :  { %v2401_v46 = vadd.f32 1e-05, %v2399_v3 }
0x15fc   :  { %3795 = vrsqrt.f32 %v2402_v45  ;;  %v2422_v1 = vpop.permute.xlu1 %2421 }
0x15fd   :  { %3797 = vrsqrt.f32 %v2401_v46  ;;  %v2424_v47 = vrot.slane %v2422_v1, 3 }
0x1606   :  { %v3796_v49 = vpop.eup %3795 }
0x1607   :  { %v3798_v60 = vpop.eup %3797  ;;  %v2406_v61 = vmul.f32 %v3796_v49, %v2390_v17 }
0x1608   :  { %v2405_v30 = vmul.f32 %v3798_v60, %v2389_v4 }
0x1609   :  { %v2412_v34 = vmul.f32 %v2410_v48, %v2406_v61 }
0x160a   :  { %v2411_v50 = vmul.f32 %v2410_v48, %v2405_v30 }
0x160b   :  { %v2418_v62 = vadd.f32 %v2416_v38, %v2412_v34 }
0x160c   :  { %v2417_v63 = vadd.f32 %v2416_v38, %v2411_v50 }
0x160e   :  { %v3727_v0 = vpack.c.bf16 %v2418_v62, %v2417_v63 }
0x1610   :  { %3729 = vmatpush3.bf16.xpose.msk.msra.mxu0 %vm4129_vm2, %v3727_v0 }
0x1617   :  { %3368 = vmatmul.mubr.msk.f32.vlgmr.msra.gmra.mrb[46].mxu0 %vm179_vm1, %v2423_v55 }
0x16ea   :  { %v2500_v27 = vpop.f32.mrb[46].mxu0 }
0x16eb   :  { %v2501_v32 = vadd.f32 %v2500_v27, %v2424_v47  ;;  %v3369_v2 = vpop.f32.mrb[47].mxu0 }
0x16ed   :  { %2505 = vst.msk [vmem:[#allocation7] sm:$0x1] %vm2504_vm4, %v2501_v32 }
0x16ee   :  { %3867 = shalt.err (!%p3864_p6)
}
0x16ef   :  { %s3868_s13 = scalar_lea.hbm %s4500_s2, 16 }
0x16f0   :  { %p3869_p7 = scmp.ne.s32.totalorder %s4500_s2, %s3868_s13  ;;  %p3872_p8 = scmp.lt.u32.totalorder %s3868_s13, %s4500_s2 }
0x16f2   :  { %p3874_p9 = pnand %p3872_p8, %p3869_p7 }
0x16f4   :  { %3877 = shalt.err (!%p3874_p9)
}
0x16f5   :  { %2515 = dma.vmem_to_hbm [thread:$0]  %s2513_s8, 16, %s4500_s2, [#allocation4]  }
0x16f6   :  { %3882 = dma.done.wait [#allocation4], 16  }
0x16f7   :  { %3883 = vsyncadd [#allocation4], 4294967280 }
0x16f8   :  { %2519 = vsyncpa [#allocation3], 1 }
0x16f9   :  { %2520 = vsyncpa [#allocation6], 1 }
0x16fa   :  { %2521 = vsyncpa [#allocation4], 1 }

</bundles_post_ra>
